<compile_context>
chip_gen: v5e
topology: v5e:2x2
jax: 0.10.0
libtpu: 0.0.40
codegen_flags: <defaults>
</compile_context>

<pallas_src>
import jax
import jax.numpy as jnp
from jax.experimental import pallas as pl
from jax.experimental.pallas import tpu as pltpu


BN_EPS = 1e-5


def _round_up(n, m):
    return ((n + m - 1) // m) * m


def _tpu_topology():
    """Return (num_tensorcores_per_chip, generation_tag). Conservative defaults."""
    kind = ""
    try:
        kind = getattr(jax.devices()[0], "device_kind", "") or ""
    except Exception:
        pass
    kind = kind.lower()
    if "v7" in kind:
        return 2, "v7x"
    if "v6" in kind:
        return 1, "v6e"
    if "v5" in kind:
        return 1, "v5e"
    return 1, "unknown"


def make_classifier_kernel(elemwise_bf16):
    """Fused MLP: 4 x (Linear+BN(eval)+ReLU) + classifier Linear, all in VMEM."""

    def kernel(x_ref,
               w1_ref, b1_ref,
               w2_ref, b2_ref,
               w3_ref, b3_ref,
               w4_ref, b4_ref,
               wc_ref, bc_ref,
               out_ref):
        def layer(h, w_ref, b_ref):
            d = jnp.dot(h, w_ref[...], preferred_element_type=jnp.float32)
            if elemwise_bf16:
                # v6e/v7x: packed bf16 bias-add + ReLU (one cast + two bf16 sweeps).
                hb = d.astype(jnp.bfloat16) + b_ref[...].astype(jnp.bfloat16)
                return jnp.maximum(hb, 0.0)
            # v5e: f32 VPU elementwise, cast once at the end.
            return jnp.maximum(d + b_ref[...], 0.0).astype(jnp.bfloat16)

        h = x_ref[...].astype(jnp.bfloat16)
        h = layer(h, w1_ref, b1_ref)
        h = layer(h, w2_ref, b2_ref)
        h = layer(h, w3_ref, b3_ref)
        h = layer(h, w4_ref, b4_ref)
        out = jnp.dot(h, wc_ref[...], preferred_element_type=jnp.float32) + bc_ref[...]
        out_ref[...] = out.astype(out_ref.dtype)

    return kernel


def classifier_forward(x, folded, output_size, *, batch_tile=1024,
                       out_dtype=jnp.float32):
    """Run the fused classifier forward pass with Pallas.

    x: (B, feature_dim) f32.
    folded: list of 5 (w_bf16[(in,out)], b_f32[(1,out)]) tuples with BN already
            folded in and the last two layers zero-padded to lane-dense widths.
    Returns (B, output_size) logits in `out_dtype` (bf16 halves the dominant
    HBM writeback stream at large B, if downstream tolerates it).
    """
    (w1, b1), (w2, b2), (w3, b3), (w4, b4), (wc, bc) = folded
    B, F = x.shape
    out_pad = wc.shape[1]

    num_tc, gen = _tpu_topology()
    elemwise_bf16 = gen in ("v6e", "v7x")

    # Batch tiling: 16-row granularity (bf16 packs 16 sublanes per vreg).
    # Only force a split across grid steps on v7x, where "parallel" actually
    # shards the steps across the two TensorCores; on single-TC chips the grid
    # is a serial loop and splitting is pure overhead.
    B16 = _round_up(max(B, 16), 16)
    tb = min(_round_up(batch_tile, 16), B16)
    if num_tc >= 2 and tb == B16 and B16 >= 32:
        tb = _round_up(pl.cdiv(B16, num_tc), 16)
    B_pad = _round_up(B16, tb)
    if B_pad != B:
        x = jnp.pad(x, ((0, B_pad - B), (0, 0)))
    grid = (B_pad // tb,)

    # Replicated weight/bias blocks: same (0,0) block every step -> kept
    # VMEM-resident; single-buffered since they never change across steps.
    def rep(shape):
        return pl.BlockSpec(shape, lambda i: (0, 0), pipeline_mode=pl.Buffered(1))

    # Only raise the scoped VMEM limit for big tiles; cap per generation
    # (v7x physical VMEM is 64 MiB -> stay near ~48 MiB, v5e/v6e have 128 MiB).
    vmem_limit = None
    if tb > 512:
        act_bytes = 4 * tb * (512 + 256 + 128 + 128)        # f32 dot temps (rough)
        io_bytes = 2 * 2 * tb * (F * 4 + out_pad * jnp.dtype(out_dtype).itemsize)
        weight_bytes = 2 << 20
        budget = 2 * act_bytes + io_bytes + weight_bytes
        cap = (48 << 20) if gen == "v7x" else (96 << 20)
        vmem_limit = int(min(max(budget, 32 << 20), cap))

    flops = 2 * B_pad * sum(int(w.shape[0]) * int(w.shape[1]) for w, _ in folded)
    bytes_accessed = (
        x.size * x.dtype.itemsize
        + sum(w.size * w.dtype.itemsize + b.size * b.dtype.itemsize
              for w, b in folded)
        + B_pad * out_pad * jnp.dtype(out_dtype).itemsize)

    out = pl.pallas_call(
        make_classifier_kernel(elemwise_bf16),
        out_shape=jax.ShapeDtypeStruct((B_pad, out_pad), out_dtype),
        grid_spec=pltpu.PrefetchScalarGridSpec(
            num_scalar_prefetch=0,
            grid=grid,
            in_specs=[
                pl.BlockSpec((tb, F), lambda i: (i, 0)),   # x tile (F left unpadded)
                rep(w1.shape), rep(b1.shape),
                rep(w2.shape), rep(b2.shape),
                rep(w3.shape), rep(b3.shape),
                rep(w4.shape), rep(b4.shape),
                rep(wc.shape), rep(bc.shape),
            ],
            out_specs=pl.BlockSpec((tb, out_pad), lambda i: (i, 0)),
        ),
        compiler_params=pltpu.CompilerParams(
            dimension_semantics=("parallel",),
            vmem_limit_bytes=vmem_limit),
        cost_estimate=pl.CostEstimate(
            flops=flops, transcendentals=0, bytes_accessed=bytes_accessed),
    )(x, w1, b1, w2, b2, w3, b3, w4, b4, wc, bc)

    return out[:B, :output_size]


def init_raw_params(key, feature_dim, output_size):
    """Deterministic parameters mirroring the PyTorch module (eval mode).

    Linear weights are stored transposed as (in_features, out_features);
    BatchNorm1d layers carry (gamma, beta, running_mean, running_var).
    """
    dims = [feature_dim, 512, 256, 128, 64, output_size]
    names = ["1", "2", "3", "4", "c"]
    params = {}
    keys = jax.random.split(key, 6 * len(names))
    ki = 0
    for name, d_in, d_out in zip(names, dims[:-1], dims[1:]):
        std = jnp.sqrt(1.0 / d_in)
        params[f"w{name}"] = (std * jax.random.normal(
            keys[ki], (d_in, d_out))).astype(jnp.float32); ki += 1
        params[f"b{name}"] = (0.01 * jax.random.normal(
            keys[ki], (d_out,))).astype(jnp.float32); ki += 1
        if name != "c":  # BN only on the 4 hidden layers
            params[f"g{name}"] = jax.random.uniform(
                keys[ki], (d_out,), minval=0.8, maxval=1.2).astype(jnp.float32); ki += 1
            params[f"beta{name}"] = (0.05 * jax.random.normal(
                keys[ki], (d_out,))).astype(jnp.float32); ki += 1
            params[f"mu{name}"] = (0.05 * jax.random.normal(
                keys[ki], (d_out,))).astype(jnp.float32); ki += 1
            params[f"var{name}"] = jax.random.uniform(
                keys[ki], (d_out,), minval=0.8, maxval=1.2).astype(jnp.float32); ki += 1
        else:
            ki += 4
    return params


def fold_and_pad_params(raw, output_size, *, h4_pad=128):
    """Fold eval-mode BN into each Linear, cast weights to bf16, and pad the
    last hidden layer / classifier to lane-dense widths."""
    out_pad = max(128, _round_up(output_size, 128))
    folded = []
    for name in ["1", "2", "3", "4"]:
        w, b = raw[f"w{name}"], raw[f"b{name}"]
        scale = raw[f"g{name}"] / jnp.sqrt(raw[f"var{name}"] + BN_EPS)
        wf = w * scale[None, :]
        bf = (b - raw[f"mu{name}"]) * scale + raw[f"beta{name}"]
        folded.append((wf, bf))
    folded.append((raw["wc"], raw["bc"]))

    # Pad layer-4 output 64 -> h4_pad and classifier (64, out) -> (h4_pad, out_pad).
    w4, b4 = folded[3]
    folded[3] = (jnp.pad(w4, ((0, 0), (0, h4_pad - w4.shape[1]))),
                 jnp.pad(b4, ((0, h4_pad - b4.shape[0]),)))
    wc, bc = folded[4]
    folded[4] = (jnp.pad(wc, ((0, h4_pad - wc.shape[0]), (0, out_pad - wc.shape[1]))),
                 jnp.pad(bc, ((0, out_pad - bc.shape[0]),)))

    return [(w.astype(jnp.bfloat16), b.reshape(1, -1).astype(jnp.float32))
            for w, b in folded]


def classifier_reference_matched(x, folded, output_size, elemwise_bf16):
    """Pure-JAX reference with the same bf16-weight / f32-accumulate recipe
    (and the same bf16/f32 elementwise path as the kernel)."""
    h = x.astype(jnp.bfloat16)
    for w, b in folded[:-1]:
        d = jnp.dot(h, w, preferred_element_type=jnp.float32)
        if elemwise_bf16:
            h = jnp.maximum(d.astype(jnp.bfloat16) + b.astype(jnp.bfloat16), 0.0)
        else:
            h = jnp.maximum(d + b, 0.0).astype(jnp.bfloat16)
    wc, bc = folded[-1]
    out = jnp.dot(h, wc, preferred_element_type=jnp.float32) + bc
    return out[:, :output_size]


def classifier_reference_f32(x, raw, output_size):
    """Full-precision reference of the original module semantics (eval mode)."""
    h = x
    for name in ["1", "2", "3", "4"]:
        h = h @ raw[f"w{name}"] + raw[f"b{name}"]
        h = (h - raw[f"mu{name}"]) / jnp.sqrt(raw[f"var{name}"] + BN_EPS)
        h = h * raw[f"g{name}"] + raw[f"beta{name}"]
        h = jnp.maximum(h, 0.0)
        # Dropout(p=0.5): identity in eval mode.
    return h @ raw["wc"] + raw["bc"]


if __name__ == "__main__":
    key = jax.random.PRNGKey(0)
    k_param, k_x = jax.random.split(key)

    feature_dim = 32
    output_size = 10
    batch = 64

    raw = init_raw_params(k_param, feature_dim, output_size)
    folded = fold_and_pad_params(raw, output_size)
    x = jax.random.normal(k_x, (batch, feature_dim), dtype=jnp.float32)

    out = classifier_forward(x, folded, output_size)
    out = jax.block_until_ready(out)
    assert out.shape == (batch, output_size)

    _, gen = _tpu_topology()
    ref_matched = classifier_reference_matched(
        x, folded, output_size, elemwise_bf16=(gen in ("v6e", "v7x")))
    assert jnp.allclose(out, ref_matched, atol=1e-2, rtol=1e-2), \
        "mismatch vs matched bf16 reference"

    ref_f32 = classifier_reference_f32(x, raw, output_size)
    assert jnp.allclose(out, ref_f32, atol=1e-1, rtol=1e-1), \
        "mismatch vs f32 module reference"

    print("KERNEL_OK")
</pallas_src>

<mosaic_0001>
module attributes {stable_mosaic.version = 11 : i64} {
  func.func @kernel(%arg0: i32, %arg1: memref<64x32xf32, #tpu.memory_space<vmem>>, %arg2: memref<32x512xbf16, #tpu.memory_space<vmem>>, %arg3: memref<1x512xf32, #tpu.memory_space<vmem>>, %arg4: memref<512x256xbf16, #tpu.memory_space<vmem>>, %arg5: memref<1x256xf32, #tpu.memory_space<vmem>>, %arg6: memref<256x128xbf16, #tpu.memory_space<vmem>>, %arg7: memref<1x128xf32, #tpu.memory_space<vmem>>, %arg8: memref<128x128xbf16, #tpu.memory_space<vmem>>, %arg9: memref<1x128xf32, #tpu.memory_space<vmem>>, %arg10: memref<128x128xbf16, #tpu.memory_space<vmem>>, %arg11: memref<1x128xf32, #tpu.memory_space<vmem>>, %arg12: memref<64x128xf32, #tpu.memory_space<vmem>>) attributes {dimension_semantics = [#tpu.dimension_semantics<parallel>], iteration_bounds = array<i64: 1>, scalar_prefetch = 0 : i64, scratch_operands = 0 : i64, tpu.core_type = #tpu.core_type<tc>, window_params = [{transform_indices = @transform_0, window_bounds = array<i64: 64, 32>}, {pipeline_mode = #tpu.pipeline_mode<synchronous>, transform_indices = @transform_1, window_bounds = array<i64: 32, 512>}, {pipeline_mode = #tpu.pipeline_mode<synchronous>, transform_indices = @transform_2, window_bounds = array<i64: 1, 512>}, {pipeline_mode = #tpu.pipeline_mode<synchronous>, transform_indices = @transform_3, window_bounds = array<i64: 512, 256>}, {pipeline_mode = #tpu.pipeline_mode<synchronous>, transform_indices = @transform_4, window_bounds = array<i64: 1, 256>}, {pipeline_mode = #tpu.pipeline_mode<synchronous>, transform_indices = @transform_5, window_bounds = array<i64: 256, 128>}, {pipeline_mode = #tpu.pipeline_mode<synchronous>, transform_indices = @transform_6, window_bounds = array<i64: 1, 128>}, {pipeline_mode = #tpu.pipeline_mode<synchronous>, transform_indices = @transform_7, window_bounds = array<i64: 128, 128>}, {pipeline_mode = #tpu.pipeline_mode<synchronous>, transform_indices = @transform_8, window_bounds = array<i64: 1, 128>}, {pipeline_mode = #tpu.pipeline_mode<synchronous>, transform_indices = @transform_9, window_bounds = array<i64: 128, 128>}, {pipeline_mode = #tpu.pipeline_mode<synchronous>, transform_indices = @transform_10, window_bounds = array<i64: 1, 128>}, {transform_indices = @transform_11, window_bounds = array<i64: 64, 128>}]} {
    %c0 = arith.constant 0 : index
    %c0_0 = arith.constant 0 : index
    %0 = vector.load %arg1[%c0, %c0_0] : memref<64x32xf32, #tpu.memory_space<vmem>>, vector<64x32xf32>
    %1 = arith.truncf %0 : vector<64x32xf32> to vector<64x32xbf16>
    %c0_1 = arith.constant 0 : index
    %c0_2 = arith.constant 0 : index
    %2 = vector.load %arg2[%c0_1, %c0_2] : memref<32x512xbf16, #tpu.memory_space<vmem>>, vector<32x512xbf16>
    %cst = arith.constant dense<0.000000e+00> : vector<64x512xf32>
    %3 = tpu.matmul %1, %2, %cst {dimension_numbers = #tpu.dot_dimension_numbers<[1], [0], [0], [1], [0, 0, 1, 1], [], []>} : vector<64x32xbf16>, vector<32x512xbf16>, vector<64x512xf32> -> vector<64x512xf32>
    %c0_3 = arith.constant 0 : index
    %c0_4 = arith.constant 0 : index
    %4 = vector.load %arg3[%c0_3, %c0_4] : memref<1x512xf32, #tpu.memory_space<vmem>>, vector<1x512xf32>
    %5 = vector.broadcast %4 : vector<1x512xf32> to vector<64x512xf32>
    %6 = arith.addf %3, %5 : vector<64x512xf32>
    %cst_5 = arith.constant 0.000000e+00 : f32
    %7 = vector.broadcast %cst_5 : f32 to vector<64x512xf32>
    %8 = arith.maximumf %6, %7 : vector<64x512xf32>
    %9 = arith.truncf %8 : vector<64x512xf32> to vector<64x512xbf16>
    %c0_6 = arith.constant 0 : index
    %c0_7 = arith.constant 0 : index
    %10 = vector.load %arg4[%c0_6, %c0_7] : memref<512x256xbf16, #tpu.memory_space<vmem>>, vector<512x256xbf16>
    %cst_8 = arith.constant dense<0.000000e+00> : vector<64x256xf32>
    %11 = tpu.matmul %9, %10, %cst_8 {dimension_numbers = #tpu.dot_dimension_numbers<[1], [0], [0], [1], [0, 0, 1, 1], [], []>} : vector<64x512xbf16>, vector<512x256xbf16>, vector<64x256xf32> -> vector<64x256xf32>
    %c0_9 = arith.constant 0 : index
    %c0_10 = arith.constant 0 : index
    %12 = vector.load %arg5[%c0_9, %c0_10] : memref<1x256xf32, #tpu.memory_space<vmem>>, vector<1x256xf32>
    %13 = vector.broadcast %12 : vector<1x256xf32> to vector<64x256xf32>
    %14 = arith.addf %11, %13 : vector<64x256xf32>
    %cst_11 = arith.constant 0.000000e+00 : f32
    %15 = vector.broadcast %cst_11 : f32 to vector<64x256xf32>
    %16 = arith.maximumf %14, %15 : vector<64x256xf32>
    %17 = arith.truncf %16 : vector<64x256xf32> to vector<64x256xbf16>
    %c0_12 = arith.constant 0 : index
    %c0_13 = arith.constant 0 : index
    %18 = vector.load %arg6[%c0_12, %c0_13] : memref<256x128xbf16, #tpu.memory_space<vmem>>, vector<256x128xbf16>
    %cst_14 = arith.constant dense<0.000000e+00> : vector<64x128xf32>
    %19 = tpu.matmul %17, %18, %cst_14 {dimension_numbers = #tpu.dot_dimension_numbers<[1], [0], [0], [1], [0, 0, 1, 1], [], []>} : vector<64x256xbf16>, vector<256x128xbf16>, vector<64x128xf32> -> vector<64x128xf32>
    %c0_15 = arith.constant 0 : index
    %c0_16 = arith.constant 0 : index
    %20 = vector.load %arg7[%c0_15, %c0_16] : memref<1x128xf32, #tpu.memory_space<vmem>>, vector<1x128xf32>
    %21 = vector.broadcast %20 : vector<1x128xf32> to vector<64x128xf32>
    %22 = arith.addf %19, %21 : vector<64x128xf32>
    %cst_17 = arith.constant 0.000000e+00 : f32
    %23 = vector.broadcast %cst_17 : f32 to vector<64x128xf32>
    %24 = arith.maximumf %22, %23 : vector<64x128xf32>
    %25 = arith.truncf %24 : vector<64x128xf32> to vector<64x128xbf16>
    %c0_18 = arith.constant 0 : index
    %c0_19 = arith.constant 0 : index
    %26 = vector.load %arg8[%c0_18, %c0_19] : memref<128x128xbf16, #tpu.memory_space<vmem>>, vector<128x128xbf16>
    %cst_20 = arith.constant dense<0.000000e+00> : vector<64x128xf32>
    %27 = tpu.matmul %25, %26, %cst_20 {dimension_numbers = #tpu.dot_dimension_numbers<[1], [0], [0], [1], [0, 0, 1, 1], [], []>} : vector<64x128xbf16>, vector<128x128xbf16>, vector<64x128xf32> -> vector<64x128xf32>
    %c0_21 = arith.constant 0 : index
    %c0_22 = arith.constant 0 : index
    %28 = vector.load %arg9[%c0_21, %c0_22] : memref<1x128xf32, #tpu.memory_space<vmem>>, vector<1x128xf32>
    %29 = vector.broadcast %28 : vector<1x128xf32> to vector<64x128xf32>
    %30 = arith.addf %27, %29 : vector<64x128xf32>
    %cst_23 = arith.constant 0.000000e+00 : f32
    %31 = vector.broadcast %cst_23 : f32 to vector<64x128xf32>
    %32 = arith.maximumf %30, %31 : vector<64x128xf32>
    %33 = arith.truncf %32 : vector<64x128xf32> to vector<64x128xbf16>
    %c0_24 = arith.constant 0 : index
    %c0_25 = arith.constant 0 : index
    %34 = vector.load %arg10[%c0_24, %c0_25] : memref<128x128xbf16, #tpu.memory_space<vmem>>, vector<128x128xbf16>
    %cst_26 = arith.constant dense<0.000000e+00> : vector<64x128xf32>
    %35 = tpu.matmul %33, %34, %cst_26 {dimension_numbers = #tpu.dot_dimension_numbers<[1], [0], [0], [1], [0, 0, 1, 1], [], []>} : vector<64x128xbf16>, vector<128x128xbf16>, vector<64x128xf32> -> vector<64x128xf32>
    %c0_27 = arith.constant 0 : index
    %c0_28 = arith.constant 0 : index
    %36 = vector.load %arg11[%c0_27, %c0_28] : memref<1x128xf32, #tpu.memory_space<vmem>>, vector<1x128xf32>
    %37 = vector.broadcast %36 : vector<1x128xf32> to vector<64x128xf32>
    %38 = arith.addf %35, %37 : vector<64x128xf32>
    %c0_29 = arith.constant 0 : index
    %c0_30 = arith.constant 0 : index
    %39 = vector.load %arg12[%c0_29, %c0_30] : memref<64x128xf32, #tpu.memory_space<vmem>>, vector<64x128xf32>
    tpu.vector_store %arg12[%c0_29, %c0_30], %38 {strides = array<i32>} : memref<64x128xf32, #tpu.memory_space<vmem>>, vector<64x128xf32>,
    return
  }
  func.func @transform_0(%arg0: i32) -> (i32, i32) {
    %c0_i32 = arith.constant 0 : i32
    %c0_i32_0 = arith.constant 0 : i32
    return %arg0, %c0_i32 : i32, i32
  }
  func.func @transform_1(%arg0: i32) -> (i32, i32) {
    %c0_i32 = arith.constant 0 : i32
    %c0_i32_0 = arith.constant 0 : i32
    %c0_i32_1 = arith.constant 0 : i32
    return %c0_i32, %c0_i32_0 : i32, i32
  }
  func.func @transform_2(%arg0: i32) -> (i32, i32) {
    %c0_i32 = arith.constant 0 : i32
    %c0_i32_0 = arith.constant 0 : i32
    %c0_i32_1 = arith.constant 0 : i32
    return %c0_i32, %c0_i32_0 : i32, i32
  }
  func.func @transform_3(%arg0: i32) -> (i32, i32) {
    %c0_i32 = arith.constant 0 : i32
    %c0_i32_0 = arith.constant 0 : i32
    %c0_i32_1 = arith.constant 0 : i32
    return %c0_i32, %c0_i32_0 : i32, i32
  }
  func.func @transform_4(%arg0: i32) -> (i32, i32) {
    %c0_i32 = arith.constant 0 : i32
    %c0_i32_0 = arith.constant 0 : i32
    %c0_i32_1 = arith.constant 0 : i32
    return %c0_i32, %c0_i32_0 : i32, i32
  }
  func.func @transform_5(%arg0: i32) -> (i32, i32) {
    %c0_i32 = arith.constant 0 : i32
    %c0_i32_0 = arith.constant 0 : i32
    %c0_i32_1 = arith.constant 0 : i32
    return %c0_i32, %c0_i32_0 : i32, i32
  }
  func.func @transform_6(%arg0: i32) -> (i32, i32) {
    %c0_i32 = arith.constant 0 : i32
    %c0_i32_0 = arith.constant 0 : i32
    %c0_i32_1 = arith.constant 0 : i32
    return %c0_i32, %c0_i32_0 : i32, i32
  }
  func.func @transform_7(%arg0: i32) -> (i32, i32) {
    %c0_i32 = arith.constant 0 : i32
    %c0_i32_0 = arith.constant 0 : i32
    %c0_i32_1 = arith.constant 0 : i32
    return %c0_i32, %c0_i32_0 : i32, i32
  }
  func.func @transform_8(%arg0: i32) -> (i32, i32) {
    %c0_i32 = arith.constant 0 : i32
    %c0_i32_0 = arith.constant 0 : i32
    %c0_i32_1 = arith.constant 0 : i32
    return %c0_i32, %c0_i32_0 : i32, i32
  }
  func.func @transform_9(%arg0: i32) -> (i32, i32) {
    %c0_i32 = arith.constant 0 : i32
    %c0_i32_0 = arith.constant 0 : i32
    %c0_i32_1 = arith.constant 0 : i32
    return %c0_i32, %c0_i32_0 : i32, i32
  }
  func.func @transform_10(%arg0: i32) -> (i32, i32) {
    %c0_i32 = arith.constant 0 : i32
    %c0_i32_0 = arith.constant 0 : i32
    %c0_i32_1 = arith.constant 0 : i32
    return %c0_i32, %c0_i32_0 : i32, i32
  }
  func.func @transform_11(%arg0: i32) -> (i32, i32) {
    %c0_i32 = arith.constant 0 : i32
    %c0_i32_0 = arith.constant 0 : i32
    return %arg0, %c0_i32 : i32, i32
  }
}

</mosaic_0001>

<bundles_post_ra>
// kernel: tpu_custom_call.1
= control target key start
LH: loop header
LB: loop body
LE: loop exit
PB: predicated region body
PF: predicated region fallthrough
CT: control target
= control target key end

     0   :  { %16 = vsyncpa [#allocation3], 0  ;;  %s2406_s0 = inlined_call_operand.vmem [shape: f32[64,32], index: 0, kind: input, shape index: {}]   ;;  %s2407_s1 = inlined_call_operand.vmem [shape: bf16[32,512], index: 1, kind: input, shape index: {}]   ;;  %s2408_s2 = inlined_call_operand.vmem [shape: f32[1,512], index: 2, kind: input, shape index: {}]   ;;  %s2409_s3 = inlined_call_operand.hbm [shape: bf16[512,256], index: 3, kind: input, shape index: {}]   ;;  %s2410_s4 = inlined_call_operand.vmem [shape: f32[1,256], index: 4, kind: input, shape index: {}]   ;;  %s2411_s5 = inlined_call_operand.hbm [shape: bf16[256,128], index: 5, kind: input, shape index: {}]   ;;  %s2412_s6 = inlined_call_operand.vmem [shape: f32[1,128], index: 6, kind: input, shape index: {}]   ;;  %s2413_s7 = inlined_call_operand.hbm [shape: bf16[128,128], index: 7, kind: input, shape index: {}]   ;;  %s2414_s8 = inlined_call_operand.vmem [shape: f32[1,128], index: 8, kind: input, shape index: {}]   ;;  %s2415_s9 = inlined_call_operand.hbm [shape: bf16[128,128], index: 9, kind: input, shape index: {}]   ;;  %s2416_s10 = inlined_call_operand.vmem [shape: f32[1,128], index: 10, kind: input, shape index: {}]   ;;  %s2417_s11 = inlined_call_operand.hbm [shape: f32[64,128], index: 11, kind: output, shape index: {}]  }
   0x1   :  { %17 = vsyncpa [#allocation6], 0 }
   0x2   :  { %18 = vsyncpa [#allocation9], 0  ;;  %s45_s19 = sshll.u32 %s2411_s5, 4  ;;  %s46_s19 = int_to_ptr.hbm [resolvable:$true] %s45_s19 }
   0x3   :  { %19 = vsyncpa [#allocation4], 0  ;;  %s2109_s20 = smov [#allocation5]   ;;  %s30_s24 = sshll.u32 %s2409_s3, 4  ;;  %s31_s24 = int_to_ptr.hbm [resolvable:$true] %s30_s24 }
   0x4   :  { %s47_s21 = sshll.u32 %s2109_s20, 4  ;;  %s2110_s25 = smov 64   ;;  %s48_s21 = int_to_ptr.vmem [resolvable:$true] %s47_s21 }
   0x5   :  { %s2111_s26 = smov 4   ;;  %s2112_s27 = smov [#allocation2]  }
   0x6   :  { %53 = dma.hbm_to_vmem [thread:$0]  %s46_s19, 2048, %s48_s21, [#allocation6], %s2110_s25, %s2110_s25, %s2111_s26  }
   0x7   :  { %s32_s28 = sshll.u32 %s2112_s27, 4  ;;  %s2113_s29 = smov 128   ;;  %s33_s28 = int_to_ptr.vmem [resolvable:$true] %s32_s28 }
   0x8   :  { %s2114_s30 = smov 8   ;;  %s60_s13 = sshll.u32 %s2413_s7, 4  ;;  %s61_s13 = int_to_ptr.hbm [resolvable:$true] %s60_s13 }
   0x9   :  { %38 = dma.hbm_to_vmem [thread:$0]  %s31_s24, 8192, %s33_s28, [#allocation3], %s2113_s29, %s2113_s29, %s2114_s30  }
   0xa   :  { %s2115_s14 = smov [#allocation7]   ;;  %s75_s17 = sshll.u32 %s2415_s9, 4  ;;  %s76_s17 = int_to_ptr.hbm [resolvable:$true] %s75_s17 }
   0xb   :  { %s62_s3 = sshll.u32 %s2115_s14, 4  ;;  %s2116_s18 = smov [#allocation8]   ;;  %s63_s3 = int_to_ptr.vmem [resolvable:$true] %s62_s3 }
   0xc   :  { %68 = dma.hbm_to_vmem [thread:$0]  %s61_s13, 1024, %s63_s3, [#allocation6], %s2110_s25, %s2110_s25, %s2111_s26  }
   0xd   :  { %s77_s19 = sshll.u32 %s2116_s18, 4  ;;  %s78_s19 = int_to_ptr.vmem [resolvable:$true] %s77_s19 }
   0xe   :  { %83 = dma.hbm_to_vmem [thread:$0]  %s76_s17, 1024, %s78_s19, [#allocation9], %s2110_s25, %s2110_s25, %s2111_s26  }
   0xf   :  { %2101 = dma.done.wait [#allocation3], 8192  }
  0x10   :  { %2102 = vsyncadd [#allocation3], 4294959104 }
  0x11   :  { %2103 = dma.done.wait [#allocation6], 3072  }
  0x12   :  { %2104 = vsyncadd [#allocation6], 4294964224 }
  0x13   :  { %2105 = dma.done.wait [#allocation9], 1024  }
  0x14   :  { %2106 = vsyncadd [#allocation9], 4294966272  ;;  %v1451_v0 = vld [vmem:[%s2407_s1 + $0x20] sm:$0xf]  ;;  %v1871_v1 = vld [vmem:[%s2407_s1 + $0x2c] sm:$0xf0] }
  0x15   :  { %v1869_v2 = vld [vmem:[%s2407_s1 + $0x24] sm:$0xf]  ;;  %v1452_v3 = vor.u32 %v1871_v1, %v1451_v0  ;;  %v1453_v4 = vld [vmem:[%s2407_s1 + $0x30] sm:$0xf0]  ;;  %v1459_v5 = vld [vmem:[%s2407_s1 + $0x28] sm:$0xf] }
  0x16   :  { %v1872_v6 = vld [vmem:[%s2407_s1 + $0x34] sm:$0xf0]  ;;  %v1456_v7 = vor.u32 %v1869_v2, %v1453_v4  ;;  %v1870_v9 = vld [vmem:[%s2407_s1 + $0x2c] sm:$0xf]  ;;  %v1461_v10 = vld [vmem:[%s2407_s1 + $0x38] sm:$0xf0] }
  0x17   :  { %v1460_v8 = vor.u32 %v1872_v6, %v1459_v5  ;;  %v1435_v11 = vld [vmem:[%s2407_s1] sm:$0xf]  ;;  %192 = vmatpush.bf16.msra.mxu0 %v1452_v3  ;;  %v1464_v12 = vor.u32 %v1870_v9, %v1461_v10  ;;  %v1867_v13 = vld [vmem:[%s2407_s1 + $0xc] sm:$0xf0]  ;;  %v1865_v14 = vld [vmem:[%s2407_s1 + $0x4] sm:$0xf] }
  0x18   :  { %v1437_v15 = vld [vmem:[%s2407_s1 + $0x10] sm:$0xf0]  ;;  %221 = vmatpush.bf16.msra.mxu1 %v1456_v7  ;;  %v1436_v16 = vor.u32 %v1867_v13, %v1435_v11  ;;  %v1443_v18 = vld [vmem:[%s2407_s1 + $0x8] sm:$0xf]  ;;  %v1868_v19 = vld [vmem:[%s2407_s1 + $0x14] sm:$0xf0] }
  0x19   :  { %250 = vmatpush.bf16.msra.mxu2 %v1460_v8  ;;  %v1440_v17 = vor.u32 %v1865_v14, %v1437_v15  ;;  %v1866_v20 = vld [vmem:[%s2407_s1 + $0xc] sm:$0xf]  ;;  %279 = vmatpush.bf16.msra.mxu3 %v1464_v12  ;;  %v1444_v21 = vor.u32 %v1868_v19, %v1443_v18  ;;  %v1445_v22 = vld [vmem:[%s2407_s1 + $0x18] sm:$0xf0]  ;;  %v103_v23 = vld [vmem:[%s2406_s0] sm:$0xff]  ;;  %vm173_vm0 = vcmask 261120  }
  0x1a   :  { %v104_v24 = vld [vmem:[%s2406_s0 + $0x8] sm:$0xff]  ;;  %v1448_v25 = vor.u32 %v1866_v20, %v1445_v22  ;;  %v105_v27 = vld [vmem:[%s2406_s0 + $0x10] sm:$0xff]  ;;  %v106_v28 = vld [vmem:[%s2406_s0 + $0x18] sm:$0xff]  ;;  %s1418_s13 = sshll.u32 %s2417_s11, 4  ;;  %s1419_s13 = int_to_ptr.hbm [resolvable:$true] %s1418_s13 }
  0x1b   :  { %v111_v26 = vpack.c.bf16 %v104_v24, %v103_v23  ;;  %193 = vmatpush.bf16.msra.mxu0 %v1436_v16  ;;  %v112_v29 = vpack.c.bf16 %v106_v28, %v105_v27  ;;  %v1667_v30 = vld [vmem:[#allocation2 + $0x170] sm:$0xf]  ;;  %v1920_v31 = vld [vmem:[#allocation2 + $0x174] sm:$0xf0]  ;;  %v1659_v41 = vld [vmem:[#allocation2 + $0x160] sm:$0xf] }
  0x1c   :  { %222 = vmatpush.bf16.msra.mxu1 %v1440_v17  ;;  %v1539_v32 = vld [vmem:[#allocation2 + $0x70] sm:$0xf]  ;;  %v1668_v33 = vor.u32 %v1920_v31, %v1667_v30  ;;  %v1888_v34 = vld [vmem:[#allocation2 + $0x74] sm:$0xf0]  ;;  %v1918_v43 = vld [vmem:[#allocation2 + $0x164] sm:$0xf0] }
  0x1d   :  { %251 = vmatpush.bf16.msra.mxu2 %v1444_v21  ;;  %280 = vmatpush.bf16.msra.mxu3 %v1448_v25  ;;  %v1731_v35 = vld [vmem:[#allocation2 + $0x1f0] sm:$0xf]  ;;  %v1936_v36 = vld [vmem:[#allocation2 + $0x1f4] sm:$0xf0]  ;;  %v1540_v37 = vor.u32 %v1888_v34, %v1539_v32  ;;  %v1531_v44 = vld [vmem:[#allocation2 + $0x60] sm:$0xf]  ;;  %v1660_v46 = vor.u32 %v1918_v43, %v1659_v41 }
  0x1e   :  { %1465 = vmatmul.msk.bf16.vlgmr.msra.gmra.mxu0 %vm173_vm0, %v111_v26  ;;  %v1732_v38 = vor.u32 %v1936_v36, %v1731_v35  ;;  %v1603_v39 = vld [vmem:[#allocation2 + $0xf0] sm:$0xf]  ;;  %v1904_v40 = vld [vmem:[#allocation2 + $0xf4] sm:$0xf0]  ;;  %v1886_v45 = vld [vmem:[#allocation2 + $0x64] sm:$0xf0] }
  0x1f   :  { %1469 = vmatmul.msk.bf16.vlgmr.msra.gmra.mxu1 %vm173_vm0, %v111_v26  ;;  %v1604_v42 = vor.u32 %v1904_v40, %v1603_v39  ;;  %740 = vmatpush.bf16.msrb.mxu0 %v1540_v37  ;;  %v1532_v47 = vor.u32 %v1886_v45, %v1531_v44  ;;  %v1723_v48 = vld [vmem:[#allocation2 + $0x1e0] sm:$0xf]  ;;  %v1934_v49 = vld [vmem:[#allocation2 + $0x1e4] sm:$0xf0]  ;;  %v1651_v55 = vld [vmem:[#allocation2 + $0x150] sm:$0xf] }
  0x20   :  { %1473 = vmatmul.msk.bf16.vlgmr.msra.gmra.mxu2 %vm173_vm0, %v111_v26  ;;  %1477 = vmatmul.msk.bf16.vlgmr.msra.gmra.mxu3 %vm173_vm0, %v111_v26  ;;  %v1595_v50 = vld [vmem:[#allocation2 + $0xe0] sm:$0xf]  ;;  %v108_v52 = vld [vmem:[%s2406_s0 + $0x28] sm:$0xff]  ;;  %v1724_v53 = vor.u32 %v1934_v49, %v1723_v48  ;;  %v1916_v56 = vld [vmem:[#allocation2 + $0x154] sm:$0xf0] }
  0x21   :  { %798 = vmatpush.bf16.msrb.mxu2 %v1668_v33  ;;  %827 = vmatpush.bf16.msrb.mxu3 %v1732_v38  ;;  %v107_v51 = vld [vmem:[%s2406_s0 + $0x20] sm:$0xff]  ;;  %v1902_v54 = vld [vmem:[#allocation2 + $0xe4] sm:$0xf0]  ;;  %v1523_v58 = vld [vmem:[#allocation2 + $0x50] sm:$0xf]  ;;  %v1652_v61 = vor.u32 %v1916_v56, %v1651_v55 }
  0x22   :  { %769 = vmatpush.bf16.msrb.mxu1 %v1604_v42  ;;  %v1596_v57 = vor.u32 %v1902_v54, %v1595_v50  ;;  %v1884_v59 = vld [vmem:[#allocation2 + $0x54] sm:$0xf0]  ;;  %v1715_v60 = vld [vmem:[#allocation2 + $0x1d0] sm:$0xf]  ;;  %v1643_v4 = vld [vmem:[#allocation2 + $0x140] sm:$0xf]  ;;  %v113_v7 = vpack.c.bf16 %v108_v52, %v107_v51 }
  0x23   :  { %v1932_v62 = vld [vmem:[#allocation2 + $0x1d4] sm:$0xf0]  ;;  %v1587_v63 = vld [vmem:[#allocation2 + $0xd0] sm:$0xf]  ;;  %741 = vmatpush.bf16.msrb.mxu0 %v1532_v47  ;;  %v1524_v1 = vor.u32 %v1884_v59, %v1523_v58  ;;  %v1914_v5 = vld [vmem:[#allocation2 + $0x144] sm:$0xf0] }
  0x24   :  { %v1900_v0 = vld [vmem:[#allocation2 + $0xd4] sm:$0xf0]  ;;  %v1716_v2 = vor.u32 %v1932_v62, %v1715_v60  ;;  %v1515_v6 = vld [vmem:[#allocation2 + $0x40] sm:$0xf]  ;;  %v1882_v8 = vld [vmem:[#allocation2 + $0x44] sm:$0xf0]  ;;  %v1644_v13 = vor.u32 %v1914_v5, %v1643_v4 }
  0x25   :  { %799 = vmatpush.bf16.msrb.mxu2 %v1660_v46  ;;  %828 = vmatpush.bf16.msrb.mxu3 %v1724_v53  ;;  %v1588_v3 = vor.u32 %v1900_v0, %v1587_v63  ;;  %v1707_v9 = vld [vmem:[#allocation2 + $0x1c0] sm:$0xf]  ;;  %v1930_v10 = vld [vmem:[#allocation2 + $0x1c4] sm:$0xf0]  ;;  %v1516_v14 = vor.u32 %v1882_v8, %v1515_v6  ;;  %v1635_v16 = vld [vmem:[#allocation2 + $0x130] sm:$0xf] }
  0x26   :  { %770 = vmatpush.bf16.msrb.mxu1 %v1596_v57  ;;  %v1579_v11 = vld [vmem:[#allocation2 + $0xc0] sm:$0xf]  ;;  %v1898_v12 = vld [vmem:[#allocation2 + $0xc4] sm:$0xf0]  ;;  %v1708_v15 = vor.u32 %v1930_v10, %v1707_v9  ;;  %v1912_v17 = vld [vmem:[#allocation2 + $0x134] sm:$0xf0] }
  0x27   :  { %742 = vmatpush.bf16.msrb.mxu0 %v1524_v1  ;;  %v1507_v18 = vld [vmem:[#allocation2 + $0x30] sm:$0xf]  ;;  %v1580_v19 = vor.u32 %v1898_v12, %v1579_v11  ;;  %v1880_v20 = vld [vmem:[#allocation2 + $0x34] sm:$0xf0]  ;;  %v1636_v25 = vor.u32 %v1912_v17, %v1635_v16  ;;  %v1627_v28 = vld [vmem:[#allocation2 + $0x120] sm:$0xf] }
  0x28   :  { %v1699_v21 = vld [vmem:[#allocation2 + $0x1b0] sm:$0xf]  ;;  %v1928_v22 = vld [vmem:[#allocation2 + $0x1b4] sm:$0xf0]  ;;  %v1508_v26 = vor.u32 %v1880_v20, %v1507_v18  ;;  %v1499_v30 = vld [vmem:[#allocation2 + $0x20] sm:$0xf] }
  0x29   :  { %800 = vmatpush.bf16.msrb.mxu2 %v1652_v61  ;;  %829 = vmatpush.bf16.msrb.mxu3 %v1716_v2  ;;  %v1571_v23 = vld [vmem:[#allocation2 + $0xb0] sm:$0xf]  ;;  %v1896_v24 = vld [vmem:[#allocation2 + $0xb4] sm:$0xf0]  ;;  %v1700_v27 = vor.u32 %v1928_v22, %v1699_v21  ;;  %v1878_v32 = vld [vmem:[#allocation2 + $0x24] sm:$0xf0] }
  0x2a   :  { %771 = vmatpush.bf16.msrb.mxu1 %v1588_v3  ;;  %v1572_v31 = vor.u32 %v1896_v24, %v1571_v23  ;;  %v1691_v33 = vld [vmem:[#allocation2 + $0x1a0] sm:$0xf]  ;;  %v1926_v34 = vld [vmem:[#allocation2 + $0x1a4] sm:$0xf0]  ;;  %v1500_v36 = vor.u32 %v1878_v32, %v1499_v30  ;;  %v109_v38 = vld [vmem:[%s2406_s0 + $0x30] sm:$0xff] }
  0x2b   :  { %743 = vmatpush.bf16.msrb.mxu0 %v1516_v14  ;;  %v1692_v37 = vor.u32 %v1926_v34, %v1691_v33  ;;  %v110_v39 = vld [vmem:[%s2406_s0 + $0x38] sm:$0xff]  ;;  %v1563_v41 = vld [vmem:[#allocation2 + $0xa0] sm:$0xf]  ;;  %v1894_v42 = vld [vmem:[#allocation2 + $0xa4] sm:$0xf0] }
  0x2c   :  { %v114_v40 = vpack.c.bf16 %v110_v39, %v109_v38  ;;  %v1564_v43 = vor.u32 %v1894_v42, %v1563_v41  ;;  %v1619_v44 = vld [vmem:[#allocation2 + $0x110] sm:$0xf]  ;;  %v1908_v45 = vld [vmem:[#allocation2 + $0x114] sm:$0xf0]  ;;  %v1483_v55 = vld [vmem:[#allocation2] sm:$0xf] }
  0x2d   :  { %801 = vmatpush.bf16.msrb.mxu2 %v1644_v13  ;;  %830 = vmatpush.bf16.msrb.mxu3 %v1708_v15  ;;  %v1620_v46 = vor.u32 %v1908_v45, %v1619_v44  ;;  %v1491_v47 = vld [vmem:[#allocation2 + $0x10] sm:$0xf]  ;;  %v1876_v48 = vld [vmem:[#allocation2 + $0x14] sm:$0xf0]  ;;  %v1874_v57 = vld [vmem:[#allocation2 + $0x4] sm:$0xf0] }
  0x2e   :  { %1466 = vmatmul.msk.bf16.gmra.mxu0 %vm173_vm0, %v112_v29  ;;  %772 = vmatpush.bf16.msrb.mxu1 %v1580_v19  ;;  %v1555_v49 = vld [vmem:[#allocation2 + $0x90] sm:$0xf]  ;;  %v1492_v50 = vor.u32 %v1876_v48, %v1491_v47  ;;  %v1892_v51 = vld [vmem:[#allocation2 + $0x94] sm:$0xf0]  ;;  %v1547_v58 = vld [vmem:[#allocation2 + $0x80] sm:$0xf]  ;;  %v1484_v60 = vor.u32 %v1874_v57, %v1483_v55 }
  0x2f   :  { %1470 = vmatmul.msk.bf16.gmra.mxu1 %vm173_vm0, %v112_v29  ;;  %744 = vmatpush.bf16.msrb.mxu0 %v1508_v26  ;;  %v1556_v52 = vor.u32 %v1892_v51, %v1555_v49  ;;  %v1683_v53 = vld [vmem:[#allocation2 + $0x190] sm:$0xf]  ;;  %v1924_v54 = vld [vmem:[#allocation2 + $0x194] sm:$0xf0]  ;;  %v1890_v59 = vld [vmem:[#allocation2 + $0x84] sm:$0xf0] }
  0x30   :  { %1474 = vmatmul.msk.bf16.gmra.mxu2 %vm173_vm0, %v112_v29  ;;  %1478 = vmatmul.msk.bf16.gmra.mxu3 %vm173_vm0, %v112_v29  ;;  %v1910_v29 = vld [vmem:[#allocation2 + $0x124] sm:$0xf0]  ;;  %v1684_v56 = vor.u32 %v1924_v54, %v1683_v53  ;;  %v1548_v61 = vor.u32 %v1890_v59, %v1547_v58  ;;  %v1611_v62 = vld [vmem:[#allocation2 + $0x100] sm:$0xf]  ;;  %v1919_v4 = vld [vmem:[#allocation2 + $0x174] sm:$0xf] }
  0x31   :  { %802 = vmatpush.bf16.msrb.mxu2 %v1636_v25  ;;  %v1628_v35 = vor.u32 %v1910_v29, %v1627_v28  ;;  %831 = vmatpush.bf16.msrb.mxu3 %v1700_v27  ;;  %v1906_v63 = vld [vmem:[#allocation2 + $0x104] sm:$0xf0]  ;;  %v1675_v1 = vld [vmem:[#allocation2 + $0x180] sm:$0xf]  ;;  %v1669_v5 = vld [vmem:[#allocation2 + $0x178] sm:$0xf0] }
  0x32   :  { %773 = vmatpush.bf16.msrb.mxu1 %v1572_v31  ;;  %v1612_v0 = vor.u32 %v1906_v63, %v1611_v62  ;;  %v1922_v2 = vld [vmem:[#allocation2 + $0x184] sm:$0xf0]  ;;  %v1672_v6 = vor.u32 %v1919_v4, %v1669_v5  ;;  %v1541_v8 = vld [vmem:[#allocation2 + $0x78] sm:$0xf0]  ;;  %v1935_v9 = vld [vmem:[#allocation2 + $0x1f4] sm:$0xf] }
  0x33   :  { %745 = vmatpush.bf16.msrb.mxu0 %v1500_v36  ;;  %v1676_v3 = vor.u32 %v1922_v2, %v1675_v1  ;;  %v1733_v11 = vld [vmem:[#allocation2 + $0x1f8] sm:$0xf0]  ;;  %v1903_v12 = vld [vmem:[#allocation2 + $0xf4] sm:$0xf]  ;;  %v1917_v16 = vld [vmem:[#allocation2 + $0x164] sm:$0xf] }
  0x34   :  { %v1605_v13 = vld [vmem:[#allocation2 + $0xf8] sm:$0xf0]  ;;  %v1736_v14 = vor.u32 %v1935_v9, %v1733_v11  ;;  %v1661_v17 = vld [vmem:[#allocation2 + $0x168] sm:$0xf0]  ;;  %v123_v19 = vld [vmem:[%s2408_s2] sm:$0xf] }
  0x35   :  { %803 = vmatpush.bf16.msrb.mxu2 %v1628_v35  ;;  %832 = vmatpush.bf16.msrb.mxu3 %v1692_v37  ;;  %v1608_v15 = vor.u32 %v1903_v12, %v1605_v13  ;;  %v1664_v18 = vor.u32 %v1917_v16, %v1661_v17  ;;  %v2284_v21 = vperm.slane %v123_v19, 0  ;;  %v2286_v23 = vperm.slane %v123_v19, 1  ;;  %v1885_v24 = vld [vmem:[#allocation2 + $0x64] sm:$0xf]  ;;  %v1533_v25 = vld [vmem:[#allocation2 + $0x68] sm:$0xf0] }
  0x36   :  { %774 = vmatpush.bf16.msrb.mxu1 %v1564_v43  ;;  %v1536_v26 = vor.u32 %v1885_v24, %v1533_v25  ;;  %v1933_v27 = vld [vmem:[#allocation2 + $0x1e4] sm:$0xf]  ;;  %v1725_v28 = vld [vmem:[#allocation2 + $0x1e8] sm:$0xf0]  ;;  %v1915_v36 = vld [vmem:[#allocation2 + $0x154] sm:$0xf] }
  0x37   :  { %746 = vmatpush.bf16.msrb.mxu0 %v1492_v50  ;;  %v1728_v30 = vor.u32 %v1933_v27, %v1725_v28  ;;  %v1901_v31 = vld [vmem:[#allocation2 + $0xe4] sm:$0xf]  ;;  %v1597_v32 = vld [vmem:[#allocation2 + $0xe8] sm:$0xf0]  ;;  %v1653_v37 = vld [vmem:[#allocation2 + $0x158] sm:$0xf0] }
  0x38   :  { %v1600_v34 = vor.u32 %v1901_v31, %v1597_v32  ;;  %v2291_v45 = vperm.slane %v123_v19, 2  ;;  %v2294_v47 = vperm.slane %v123_v19, 3  ;;  %v1883_v49 = vld [vmem:[#allocation2 + $0x54] sm:$0xf]  ;;  %v1525_v50 = vld [vmem:[#allocation2 + $0x58] sm:$0xf0] }
  0x39   :  { %804 = vmatpush.bf16.msrb.mxu2 %v1620_v46  ;;  %833 = vmatpush.bf16.msrb.mxu3 %v1684_v56  ;;  %v1931_v53 = vld [vmem:[#allocation2 + $0x1d4] sm:$0xf]  ;;  %v1717_v54 = vld [vmem:[#allocation2 + $0x1d8] sm:$0xf0]  ;;  %v1913_v59 = vld [vmem:[#allocation2 + $0x144] sm:$0xf] }
  0x3a   :  { %775 = vmatpush.bf16.msrb.mxu1 %v1556_v52  ;;  %v1528_v52 = vor.u32 %v1883_v49, %v1525_v50  ;;  %v1720_v56 = vor.u32 %v1931_v53, %v1717_v54  ;;  %v1899_v57 = vld [vmem:[#allocation2 + $0xd4] sm:$0xf]  ;;  %v1589_v58 = vld [vmem:[#allocation2 + $0xd8] sm:$0xf0]  ;;  %v1645_v63 = vld [vmem:[#allocation2 + $0x148] sm:$0xf0] }
  0x3b   :  { %747 = vmatpush.bf16.msrb.mxu0 %v1484_v60  ;;  %v1592_v62 = vor.u32 %v1899_v57, %v1589_v58  ;;  %v1648_v2 = vor.u32 %v1913_v59, %v1645_v63  ;;  %v1881_v12 = vld [vmem:[#allocation2 + $0x44] sm:$0xf]  ;;  %v1517_v13 = vld [vmem:[#allocation2 + $0x48] sm:$0xf0]  ;;  %v1911_v28 = vld [vmem:[#allocation2 + $0x134] sm:$0xf] }
  0x3c   :  { %v1929_v16 = vld [vmem:[#allocation2 + $0x1c4] sm:$0xf]  ;;  %v1709_v17 = vld [vmem:[#allocation2 + $0x1c8] sm:$0xf0]  ;;  %v1895_v49 = vld [vmem:[#allocation2 + $0xb4] sm:$0xf] }
  0x3d   :  { %805 = vmatpush.bf16.msrb.mxu2 %v1612_v0  ;;  %834 = vmatpush.bf16.msrb.mxu3 %v1676_v3  ;;  %v1581_v24 = vld [vmem:[#allocation2 + $0xc8] sm:$0xf0]  ;;  %v1573_v50 = vld [vmem:[#allocation2 + $0xb8] sm:$0xf0] }
  0x3e   :  { %1467 = vmatmul.msk.bf16.gmra.mxu0 %vm173_vm0, %v113_v7  ;;  %776 = vmatpush.bf16.msrb.mxu1 %v1548_v61  ;;  %v1576_v54 = vor.u32 %v1895_v49, %v1573_v50  ;;  %v1549_v50 = vld [vmem:[#allocation2 + $0x88] sm:$0xf0] }
  0x3f   :  { %1471 = vmatmul.msk.bf16.gmra.mxu1 %vm173_vm0, %v113_v7 }
  0x40   :  { %1475 = vmatmul.msk.bf16.gmra.mxu2 %vm173_vm0, %v113_v7  ;;  %1479 = vmatmul.msk.bf16.gmra.mxu3 %vm173_vm0, %v113_v7  ;;  %v1887_v7 = vld [vmem:[#allocation2 + $0x74] sm:$0xf] }
  0x41   :  { %914 = vmatpush.bf16.msra.mxu2 %v1672_v6  ;;  %v1544_v10 = vor.u32 %v1887_v7, %v1541_v8  ;;  %943 = vmatpush.bf16.msra.mxu3 %v1736_v14 }
  0x42   :  { %885 = vmatpush.bf16.msra.mxu1 %v1608_v15  ;;  %v1520_v15 = vor.u32 %v1881_v12, %v1517_v13  ;;  %v1693_v12 = vld [vmem:[#allocation2 + $0x1a8] sm:$0xf0] }
  0x43   :  { %856 = vmatpush.bf16.msra.mxu0 %v1544_v10 }
  0x45   :  { %915 = vmatpush.bf16.msra.mxu2 %v1664_v18  ;;  %944 = vmatpush.bf16.msra.mxu3 %v1728_v30 }
  0x46   :  { %886 = vmatpush.bf16.msra.mxu1 %v1600_v34 }
  0x47   :  { %857 = vmatpush.bf16.msra.mxu0 %v1536_v26 }
  0x49   :  { %945 = vmatpush.bf16.msra.mxu3 %v1720_v56  ;;  %v1629_v56 = vld [vmem:[#allocation2 + $0x128] sm:$0xf0] }
  0x4a   :  { %887 = vmatpush.bf16.msra.mxu1 %v1592_v62 }
  0x4b   :  { %858 = vmatpush.bf16.msra.mxu0 %v1528_v52 }
  0x4e   :  { %1468 = vmatmul.msk.bf16.gmra.mxu0 %vm173_vm0, %v114_v40 }
  0x4f   :  { %1472 = vmatmul.msk.bf16.gmra.mxu1 %vm173_vm0, %v114_v40  ;;  %859 = vmatpush.bf16.msra.mxu0 %v1520_v15 }
  0x50   :  { %1476 = vmatmul.msk.bf16.gmra.mxu2 %vm173_vm0, %v114_v40  ;;  %1480 = vmatmul.msk.bf16.gmra.mxu3 %vm173_vm0, %v114_v40  ;;  %v1656_v40 = vor.u32 %v1915_v36, %v1653_v37 }
  0x52   :  { %916 = vmatpush.bf16.msra.mxu2 %v1656_v40  ;;  %v1509_v40 = vld [vmem:[#allocation2 + $0x38] sm:$0xf0] }
  0x56   :  { %917 = vmatpush.bf16.msra.mxu2 %v1648_v2 }
  0x9b   :  { %v195_v20 = vpop.f32.mrf.mxu0 }
  0x9c   :  { %v224_v22 = vpop.f32.mrf.mxu1  ;;  %v196_v29 = vadd.f32 %v195_v20, %v2284_v21  ;;  %v1712_v20 = vor.u32 %v1929_v16, %v1709_v17  ;;  %v1893_v16 = vld [vmem:[#allocation2 + $0xa4] sm:$0xf]  ;;  %v1565_v17 = vld [vmem:[#allocation2 + $0xa8] sm:$0xf0] }
  0x9d   :  { %v225_v33 = vadd.f32 %v224_v22, %v2286_v23  ;;  %v1897_v22 = vld [vmem:[#allocation2 + $0xc4] sm:$0xf] }
  0x9e   :  { %v302_v41 = vmax.f32 %v196_v29, 0.0  ;;  %v1584_v26 = vor.u32 %v1897_v22, %v1581_v24  ;;  %v1637_v29 = vld [vmem:[#allocation2 + $0x138] sm:$0xf0]  ;;  %946 = vmatpush.bf16.msra.mxu3 %v1712_v20  ;;  %v1568_v22 = vor.u32 %v1893_v16, %v1565_v17 }
  0x9f   :  { %v303_v44 = vmax.f32 %v225_v33, 0.0  ;;  %v1640_v32 = vor.u32 %v1911_v28, %v1637_v29 }
  0xa0   :  { %888 = vmatpush.bf16.msra.mxu1 %v1584_v26  ;;  %v1621_v26 = vld [vmem:[#allocation2 + $0x118] sm:$0xf0] }
  0xa1   :  { %918 = vmatpush.bf16.msra.mxu2 %v1640_v32  ;;  %v1923_v32 = vld [vmem:[#allocation2 + $0x194] sm:$0xf] }
  0xa3   :  { %v253_v35 = vpop.f32.mrf.mxu2  ;;  %v282_v38 = vpop.f32.mrf.mxu3 }
  0xa4   :  { %v197_v39 = vpop.f32.mrf.mxu0  ;;  %v226_v43 = vpop.f32.mrf.mxu1  ;;  %v254_v60 = vadd.f32 %v253_v35, %v2291_v45  ;;  %v283_v0 = vadd.f32 %v282_v38, %v2294_v47  ;;  %889 = vmatpush.bf16.msra.mxu1 %v1576_v54 }
  0xa5   :  { %v198_v42 = vadd.f32 %v197_v39, %v2284_v21  ;;  %v227_v46 = vadd.f32 %v226_v43, %v2286_v23  ;;  %v1879_v39 = vld [vmem:[#allocation2 + $0x34] sm:$0xf] }
  0xa6   :  { %v304_v8 = vmax.f32 %v254_v60, 0.0  ;;  %v305_v10 = vmax.f32 %v283_v0, 0.0  ;;  %v1927_v43 = vld [vmem:[#allocation2 + $0x1b4] sm:$0xf] }
  0xa7   :  { %v306_v48 = vmax.f32 %v198_v42, 0.0  ;;  %v307_v51 = vmax.f32 %v227_v46, 0.0  ;;  %v1512_v42 = vor.u32 %v1879_v39, %v1509_v40  ;;  %v1557_v39 = vld [vmem:[#allocation2 + $0x98] sm:$0xf0]  ;;  %v1873_v40 = vld [vmem:[#allocation2 + $0x4] sm:$0xf] }
  0xa8   :  { %890 = vmatpush.bf16.msra.mxu1 %v1568_v22 }
  0xa9   :  { %v2296_v55 = vpack.c.bf16 %v306_v48, %v302_v41  ;;  %v2299_v61 = vpack.c.bf16 %v307_v51, %v303_v44  ;;  %v1701_v44 = vld [vmem:[#allocation2 + $0x1b8] sm:$0xf0]  ;;  %v1909_v51 = vld [vmem:[#allocation2 + $0x124] sm:$0xf]  ;;  %860 = vmatpush.bf16.msra.mxu0 %v1512_v42 }
  0xaa   :  { %v1704_v48 = vor.u32 %v1927_v43, %v1701_v44  ;;  %v1632_v59 = vor.u32 %v1909_v51, %v1629_v56  ;;  %v1485_v44 = vld [vmem:[#allocation2 + $0x8] sm:$0xf0]  ;;  %v1905_v51 = vld [vmem:[#allocation2 + $0x104] sm:$0xf] }
  0xab   :  { %v255_v1 = vpop.f32.mrf.mxu2  ;;  %748 = vmatmul.bf16.vlgmr.msrb.gmra.mxu0 %v2296_v55  ;;  %v284_v4 = vpop.f32.mrf.mxu3  ;;  %777 = vmatmul.bf16.vlgmr.msrb.gmra.mxu1 %v2299_v61  ;;  %v1488_v54 = vor.u32 %v1873_v40, %v1485_v44  ;;  %v1613_v56 = vld [vmem:[#allocation2 + $0x108] sm:$0xf0] }
  0xac   :  { %v256_v3 = vadd.f32 %v255_v1, %v2291_v45  ;;  %v200_v5 = vpop.f32.mrf.mxu0  ;;  %v285_v6 = vadd.f32 %v284_v4, %v2294_v47  ;;  %v229_v7 = vpop.f32.mrf.mxu1  ;;  %947 = vmatpush.bf16.msra.mxu3 %v1704_v48  ;;  %919 = vmatpush.bf16.msra.mxu2 %v1632_v59  ;;  %v1889_v48 = vld [vmem:[#allocation2 + $0x84] sm:$0xf]  ;;  %v1616_v59 = vor.u32 %v1905_v51, %v1613_v56  ;;  %v1951_v56 = vld [vmem:[#allocation5 + $0x70] sm:$0xff] }
  0xad   :  { %v201_v18 = vadd.f32 %v200_v5, %v2284_v21  ;;  %v230_v25 = vadd.f32 %v229_v7, %v2286_v23  ;;  %v1877_v7 = vld [vmem:[#allocation2 + $0x24] sm:$0xf] }
  0xae   :  { %v308_v9 = vmax.f32 %v256_v3, 0.0  ;;  %v309_v11 = vmax.f32 %v285_v6, 0.0 }
  0xaf   :  { %v310_v33 = vmax.f32 %v201_v18, 0.0  ;;  %v311_v36 = vmax.f32 %v230_v25, 0.0  ;;  %v1907_v25 = vld [vmem:[#allocation2 + $0x114] sm:$0xf] }
  0xb0   :  { %v2306_v14 = vpack.c.bf16 %v308_v9, %v304_v8  ;;  %v2309_v19 = vpack.c.bf16 %v309_v11, %v305_v10  ;;  %v1501_v8 = vld [vmem:[#allocation2 + $0x28] sm:$0xf0]  ;;  %v1925_v11 = vld [vmem:[#allocation2 + $0x1a4] sm:$0xf] }
  0xb1   :  { %v1504_v10 = vor.u32 %v1877_v7, %v1501_v8  ;;  %v1696_v15 = vor.u32 %v1925_v11, %v1693_v12 }
  0xb2   :  { %806 = vmatmul.bf16.vlgmr.msrb.gmra.mxu2 %v2306_v14  ;;  %835 = vmatmul.bf16.vlgmr.msrb.gmra.mxu3 %v2309_v19 }
  0xb3   :  { %v258_v27 = vpop.f32.mrf.mxu2  ;;  %v287_v30 = vpop.f32.mrf.mxu3  ;;  %861 = vmatpush.bf16.msra.mxu0 %v1504_v10  ;;  %948 = vmatpush.bf16.msra.mxu3 %v1696_v15 }
  0xb4   :  { %v202_v31 = vpop.f32.mrf.mxu0  ;;  %v231_v35 = vpop.f32.mrf.mxu1  ;;  %v259_v52 = vadd.f32 %v258_v27, %v2291_v45  ;;  %v288_v57 = vadd.f32 %v287_v30, %v2294_v47  ;;  %v1875_v27 = vld [vmem:[#allocation2 + $0x14] sm:$0xf]  ;;  %v1624_v30 = vor.u32 %v1907_v25, %v1621_v26 }
  0xb5   :  { %v203_v34 = vadd.f32 %v202_v31, %v2284_v21  ;;  %v232_v37 = vadd.f32 %v231_v35, %v2286_v23  ;;  %v1493_v31 = vld [vmem:[#allocation2 + $0x18] sm:$0xf0] }
  0xb6   :  { %v312_v2 = vmax.f32 %v259_v52, 0.0  ;;  %v313_v5 = vmax.f32 %v288_v57, 0.0  ;;  %920 = vmatpush.bf16.msra.mxu2 %v1624_v30 }
  0xb7   :  { %v314_v38 = vmax.f32 %v203_v34, 0.0  ;;  %v315_v41 = vmax.f32 %v232_v37, 0.0 }
  0xb9   :  { %v2316_v46 = vpack.c.bf16 %v314_v38, %v310_v33  ;;  %v2319_v53 = vpack.c.bf16 %v315_v41, %v311_v36  ;;  %v1685_v33 = vld [vmem:[#allocation2 + $0x198] sm:$0xf0]  ;;  %v1496_v36 = vor.u32 %v1875_v27, %v1493_v31  ;;  %v1891_v38 = vld [vmem:[#allocation2 + $0x94] sm:$0xf] }
  0xba   :  { %v1688_v37 = vor.u32 %v1923_v32, %v1685_v33  ;;  %v1560_v43 = vor.u32 %v1891_v38, %v1557_v39  ;;  %921 = vmatpush.bf16.msra.mxu2 %v1616_v59 }
  0xbb   :  { %v260_v58 = vpop.f32.mrf.mxu2  ;;  %753 = vmatmul.bf16.gmra.mxu0 %v2316_v46  ;;  %v289_v62 = vpop.f32.mrf.mxu3  ;;  %782 = vmatmul.bf16.gmra.mxu1 %v2319_v53 }
  0xbc   :  { %v261_v60 = vadd.f32 %v260_v58, %v2291_v45  ;;  %v205_v63 = vpop.f32.mrf.mxu0  ;;  %v290_v0 = vadd.f32 %v289_v62, %v2294_v47  ;;  %v234_v1 = vpop.f32.mrf.mxu1  ;;  %862 = vmatpush.bf16.msra.mxu0 %v1496_v36  ;;  %949 = vmatpush.bf16.msra.mxu3 %v1688_v37  ;;  %v1552_v58 = vor.u32 %v1889_v48, %v1549_v50  ;;  %v1952_v48 = vld [vmem:[#allocation5 + $0x78] sm:$0xff] }
  0xbd   :  { %v206_v4 = vadd.f32 %v205_v63, %v2284_v21  ;;  %v235_v20 = vadd.f32 %v234_v1, %v2286_v23  ;;  %891 = vmatpush.bf16.msra.mxu1 %v1560_v43 }
  0xbe   :  { %v316_v3 = vmax.f32 %v261_v60, 0.0  ;;  %v317_v6 = vmax.f32 %v290_v0, 0.0 }
  0xbf   :  { %v318_v18 = vmax.f32 %v206_v4, 0.0  ;;  %v319_v41 = vmax.f32 %v235_v20, 0.0  ;;  %v1921_v4 = vld [vmem:[#allocation2 + $0x184] sm:$0xf] }
  0xc0   :  { %v2327_v9 = vpack.c.bf16 %v316_v3, %v312_v2  ;;  %v2329_v13 = vpack.c.bf16 %v317_v6, %v313_v5  ;;  %863 = vmatpush.bf16.msra.mxu0 %v1488_v54  ;;  %v1677_v5 = vld [vmem:[#allocation2 + $0x188] sm:$0xf0] }
  0xc1   :  { %892 = vmatpush.bf16.msra.mxu1 %v1552_v58  ;;  %v1680_v8 = vor.u32 %v1921_v4, %v1677_v5 }
  0xc2   :  { %811 = vmatmul.bf16.gmra.mxu2 %v2327_v9  ;;  %840 = vmatmul.bf16.gmra.mxu3 %v2329_v13 }
  0xc3   :  { %v263_v24 = vpop.f32.mrf.mxu2  ;;  %v292_v28 = vpop.f32.mrf.mxu3  ;;  %950 = vmatpush.bf16.msra.mxu3 %v1680_v8 }
  0xc4   :  { %v207_v29 = vpop.f32.mrf.mxu0  ;;  %v236_v35 = vpop.f32.mrf.mxu1  ;;  %v264_v60 = vadd.f32 %v263_v24, %v2291_v45  ;;  %v293_v63 = vadd.f32 %v292_v28, %v2294_v47 }
  0xc5   :  { %v208_v34 = vadd.f32 %v207_v29, %v2284_v21  ;;  %v237_v42 = vadd.f32 %v236_v35, %v2286_v23  ;;  %1157 = vmatpush.bf16.msrb.mxu1 %v1952_v48 }
  0xc6   :  { %v320_v10 = vmax.f32 %v264_v60, 0.0  ;;  %v321_v12 = vmax.f32 %v293_v63, 0.0 }
  0xc7   :  { %v322_v49 = vmax.f32 %v208_v34, 0.0  ;;  %v323_v52 = vmax.f32 %v237_v42, 0.0 }
  0xc9   :  { %v2336_v57 = vpack.c.bf16 %v322_v49, %v318_v18  ;;  %v2339_v62 = vpack.c.bf16 %v323_v52, %v319_v41  ;;  %v2367_v49 = vld [vmem:[%s2410_s4] sm:$0x3]  ;;  %1158 = vmatpush.bf16.msrb.mxu1 %v1951_v56 }
  0xca   :  { %v2370_v50 = vperm.slane %v2367_v49, 0 }
  0xcb   :  { %v265_v0 = vpop.f32.mrf.mxu2  ;;  %758 = vmatmul.bf16.gmra.mxu0 %v2336_v57  ;;  %v294_v2 = vpop.f32.mrf.mxu3  ;;  %787 = vmatmul.bf16.gmra.mxu1 %v2339_v62 }
  0xcc   :  { %v266_v1 = vadd.f32 %v265_v0, %v2291_v45  ;;  %v210_v3 = vpop.f32.mrf.mxu0  ;;  %v295_v6 = vadd.f32 %v294_v2, %v2294_v47  ;;  %v239_v7 = vpop.f32.mrf.mxu1 }
  0xcd   :  { %v211_v17 = vadd.f32 %v210_v3, %v2284_v21  ;;  %v240_v20 = vadd.f32 %v239_v7, %v2286_v23 }
  0xce   :  { %v324_v11 = vmax.f32 %v266_v1, 0.0  ;;  %v325_v15 = vmax.f32 %v295_v6, 0.0  ;;  %v1950_v1 = vld [vmem:[#allocation5 + $0x68] sm:$0xff] }
  0xcf   :  { %v326_v26 = vmax.f32 %v211_v17, 0.0  ;;  %v327_v29 = vmax.f32 %v240_v20, 0.0  ;;  %1159 = vmatpush.bf16.msrb.mxu1 %v1950_v1  ;;  %v1949_v17 = vld [vmem:[#allocation5 + $0x60] sm:$0xff] }
  0xd0   :  { %v344_v16 = vpack.c.bf16 %v324_v11, %v320_v10  ;;  %v345_v18 = vpack.c.bf16 %v325_v15, %v321_v12 }
  0xd2   :  { %816 = vmatmul.bf16.gmra.mxu2 %v344_v16  ;;  %845 = vmatmul.bf16.gmra.mxu3 %v345_v18 }
  0xd3   :  { %v268_v22 = vpop.f32.mrf.mxu2  ;;  %v297_v24 = vpop.f32.mrf.mxu3  ;;  %1160 = vmatpush.bf16.msrb.mxu1 %v1949_v17 }
  0xd4   :  { %v212_v25 = vpop.f32.mrf.mxu0  ;;  %v241_v28 = vpop.f32.mrf.mxu1  ;;  %v269_v34 = vadd.f32 %v268_v22, %v2291_v45  ;;  %v298_v36 = vadd.f32 %v297_v24, %v2294_v47 }
  0xd5   :  { %v213_v27 = vadd.f32 %v212_v25, %v2284_v21  ;;  %v242_v30 = vadd.f32 %v241_v28, %v2286_v23  ;;  %v1948_v28 = vld [vmem:[#allocation5 + $0x58] sm:$0xff] }
  0xd6   :  { %v328_v40 = vmax.f32 %v269_v34, 0.0  ;;  %v329_v42 = vmax.f32 %v298_v36, 0.0 }
  0xd7   :  { %v330_v31 = vmax.f32 %v213_v27, 0.0  ;;  %v331_v32 = vmax.f32 %v242_v30, 0.0  ;;  %1161 = vmatpush.bf16.msrb.mxu1 %v1948_v28 }
  0xd9   :  { %v346_v33 = vpack.c.bf16 %v330_v31, %v326_v26  ;;  %v347_v35 = vpack.c.bf16 %v331_v32, %v327_v29 }
  0xdb   :  { %v270_v37 = vpop.f32.mrf.mxu2  ;;  %763 = vmatmul.bf16.gmra.mxu0 %v346_v33  ;;  %v299_v39 = vpop.f32.mrf.mxu3  ;;  %792 = vmatmul.bf16.gmra.mxu1 %v347_v35 }
  0xdc   :  { %v271_v38 = vadd.f32 %v270_v37, %v2291_v45  ;;  %v300_v21 = vadd.f32 %v299_v39, %v2294_v47  ;;  %v1944_v45 = vld [vmem:[#allocation5 + $0x38] sm:$0xff]  ;;  %v1943_v47 = vld [vmem:[#allocation5 + $0x30] sm:$0xff] }
  0xdd   :  { %1128 = vmatpush.bf16.msrb.mxu0 %v1944_v45 }
  0xde   :  { %v332_v41 = vmax.f32 %v271_v38, 0.0  ;;  %v333_v23 = vmax.f32 %v300_v21, 0.0 }
  0xe0   :  { %v348_v43 = vpack.c.bf16 %v332_v41, %v328_v40  ;;  %v349_v44 = vpack.c.bf16 %v333_v23, %v329_v42  ;;  %v1947_v40 = vld [vmem:[#allocation5 + $0x50] sm:$0xff] }
  0xe1   :  { %1129 = vmatpush.bf16.msrb.mxu0 %v1943_v47  ;;  %1162 = vmatpush.bf16.msrb.mxu1 %v1947_v40 }
  0xe2   :  { %821 = vmatmul.bf16.gmra.mxu2 %v348_v43  ;;  %850 = vmatmul.bf16.gmra.mxu3 %v349_v44 }
  0xeb   :  { %864 = vmatmul.bf16.vlgmr.msra.gmra.mxu0 %v2296_v55  ;;  %893 = vmatmul.bf16.vlgmr.msra.gmra.mxu1 %v2299_v61  ;;  %v1942_v55 = vld [vmem:[#allocation5 + $0x28] sm:$0xff]  ;;  %v1941_v61 = vld [vmem:[#allocation5 + $0x20] sm:$0xff] }
  0xec   :  { %1130 = vmatpush.bf16.msrb.mxu0 %v1942_v55  ;;  %v1946_v55 = vld [vmem:[#allocation5 + $0x48] sm:$0xff] }
  0xed   :  { %1163 = vmatpush.bf16.msrb.mxu1 %v1946_v55 }
  0xf0   :  { %1131 = vmatpush.bf16.msrb.mxu0 %v1941_v61 }
  0xf2   :  { %922 = vmatmul.bf16.vlgmr.msra.gmra.mxu2 %v2306_v14  ;;  %951 = vmatmul.bf16.vlgmr.msra.gmra.mxu3 %v2309_v19  ;;  %v1940_v14 = vld [vmem:[#allocation5 + $0x18] sm:$0xff]  ;;  %v1939_v19 = vld [vmem:[#allocation5 + $0x10] sm:$0xff] }
  0xf4   :  { %1132 = vmatpush.bf16.msrb.mxu0 %v1940_v14 }
  0xf8   :  { %1133 = vmatpush.bf16.msrb.mxu0 %v1939_v19 }
  0xfb   :  { %869 = vmatmul.bf16.gmra.mxu0 %v2316_v46  ;;  %898 = vmatmul.bf16.gmra.mxu1 %v2319_v53  ;;  %v1938_v46 = vld [vmem:[#allocation5 + $0x8] sm:$0xff]  ;;  %v1937_v53 = vld [vmem:[#allocation5] sm:$0xff] }
  0xfc   :  { %1134 = vmatpush.bf16.msrb.mxu0 %v1938_v46 }
 0x100   :  { %1135 = vmatpush.bf16.msrb.mxu0 %v1937_v53 }
 0x102   :  { %927 = vmatmul.bf16.gmra.mxu2 %v2327_v9  ;;  %956 = vmatmul.bf16.gmra.mxu3 %v2329_v13 }
 0x10b   :  { %874 = vmatmul.bf16.gmra.mxu0 %v2336_v57  ;;  %903 = vmatmul.bf16.gmra.mxu1 %v2339_v62 }
 0x112   :  { %932 = vmatmul.bf16.gmra.mxu2 %v344_v16  ;;  %961 = vmatmul.bf16.gmra.mxu3 %v345_v18 }
 0x11b   :  { %879 = vmatmul.bf16.gmra.mxu0 %v346_v33  ;;  %908 = vmatmul.bf16.gmra.mxu1 %v347_v35 }
 0x122   :  { %937 = vmatmul.bf16.gmra.mxu2 %v348_v43  ;;  %966 = vmatmul.bf16.gmra.mxu3 %v349_v44 }
 0x128   :  { %v749_v9 = vpop.f32.mrf.mxu0  ;;  %v778_v13 = vpop.f32.mrf.mxu1 }
 0x129   :  { %v750_v54 = vadd.f32 %v749_v9, %v2370_v50 }
 0x12b   :  { %v779_v59 = vadd.f32 %v778_v13, %v750_v54  ;;  %v1945_v54 = vld [vmem:[#allocation5 + $0x40] sm:$0xff] }
 0x12c   :  { %1164 = vmatpush.bf16.msrb.mxu1 %v1945_v54 }
 0x130   :  { %v751_v51 = vpop.f32.mrf.mxu0  ;;  %v780_v52 = vpop.f32.mrf.mxu1 }
 0x131   :  { %v752_v60 = vadd.f32 %v751_v51, %v2370_v50 }
 0x133   :  { %v781_v2 = vadd.f32 %v780_v52, %v752_v60 }
 0x135   :  { %v807_v57 = vpop.f32.mrf.mxu2  ;;  %v836_v58 = vpop.f32.mrf.mxu3 }
 0x136   :  { %v808_v0 = vadd.f32 %v807_v57, %v779_v59 }
 0x138   :  { %v754_v62 = vpop.f32.mrf.mxu0  ;;  %v783_v63 = vpop.f32.mrf.mxu1  ;;  %v837_v4 = vadd.f32 %v836_v58, %v808_v0 }
 0x139   :  { %v755_v15 = vadd.f32 %v754_v62, %v2370_v50 }
 0x13a   :  { %v972_v11 = vmax.f32 %v837_v4, 0.0 }
 0x13b   :  { %v784_v22 = vadd.f32 %v783_v63, %v755_v15 }
 0x13d   :  { %v809_v3 = vpop.f32.mrf.mxu2  ;;  %v838_v6 = vpop.f32.mrf.mxu3 }
 0x13e   :  { %v810_v5 = vadd.f32 %v809_v3, %v781_v2 }
 0x140   :  { %v839_v7 = vadd.f32 %v838_v6, %v810_v5  ;;  %v756_v8 = vpop.f32.mrf.mxu0  ;;  %v785_v10 = vpop.f32.mrf.mxu1 }
 0x141   :  { %v757_v24 = vadd.f32 %v756_v8, %v2370_v50 }
 0x142   :  { %v974_v12 = vmax.f32 %v839_v7, 0.0  ;;  %v2381_v7 = vperm.slane %v2367_v49, 1 }
 0x143   :  { %v786_v29 = vadd.f32 %v785_v10, %v757_v24 }
 0x144   :  { %v988_v16 = vpack.c.bf16 %v974_v12, %v972_v11 }
 0x145   :  { %v812_v18 = vpop.f32.mrf.mxu2  ;;  %v841_v20 = vpop.f32.mrf.mxu3 }
 0x146   :  { %1136 = vmatmul.bf16.vlgmr.msrb.gmra.mxu0 %v988_v16  ;;  %v813_v27 = vadd.f32 %v812_v18, %v784_v22 }
 0x148   :  { %v759_v25 = vpop.f32.mrf.mxu0  ;;  %v788_v26 = vpop.f32.mrf.mxu1  ;;  %v842_v31 = vadd.f32 %v841_v20, %v813_v27 }
 0x149   :  { %v760_v39 = vadd.f32 %v759_v25, %v2370_v50 }
 0x14a   :  { %v976_v37 = vmax.f32 %v842_v31, 0.0 }
 0x14b   :  { %v789_v23 = vadd.f32 %v788_v26, %v760_v39 }
 0x14d   :  { %v814_v30 = vpop.f32.mrf.mxu2  ;;  %v843_v33 = vpop.f32.mrf.mxu3 }
 0x14e   :  { %v815_v32 = vadd.f32 %v814_v30, %v786_v29 }
 0x150   :  { %v844_v34 = vadd.f32 %v843_v33, %v815_v32  ;;  %v761_v35 = vpop.f32.mrf.mxu0  ;;  %v790_v36 = vpop.f32.mrf.mxu1 }
 0x151   :  { %v762_v43 = vadd.f32 %v761_v35, %v2370_v50 }
 0x152   :  { %v978_v38 = vmax.f32 %v844_v34, 0.0 }
 0x153   :  { %v791_v61 = vadd.f32 %v790_v36, %v762_v43 }
 0x154   :  { %v990_v21 = vpack.c.bf16 %v978_v38, %v976_v37 }
 0x155   :  { %v817_v41 = vpop.f32.mrf.mxu2  ;;  %v846_v42 = vpop.f32.mrf.mxu3 }
 0x156   :  { %1141 = vmatmul.bf16.gmra.mxu0 %v990_v21  ;;  %v818_v47 = vadd.f32 %v817_v41, %v789_v23 }
 0x158   :  { %v764_v44 = vpop.f32.mrf.mxu0  ;;  %v793_v45 = vpop.f32.mrf.mxu1  ;;  %v847_v19 = vadd.f32 %v846_v42, %v818_v47 }
 0x159   :  { %v765_v56 = vadd.f32 %v764_v44, %v2370_v50 }
 0x15a   :  { %v980_v51 = vmax.f32 %v847_v19, 0.0 }
 0x15b   :  { %v794_v60 = vadd.f32 %v793_v45, %v765_v56 }
 0x15d   :  { %v819_v14 = vpop.f32.mrf.mxu2  ;;  %v848_v53 = vpop.f32.mrf.mxu3 }
 0x15e   :  { %v820_v46 = vadd.f32 %v819_v14, %v791_v61 }
 0x160   :  { %v849_v9 = vadd.f32 %v848_v53, %v820_v46  ;;  %v766_v13 = vpop.f32.mrf.mxu0  ;;  %v795_v48 = vpop.f32.mrf.mxu1 }
 0x161   :  { %v767_v62 = vadd.f32 %v766_v13, %v2370_v50 }
 0x162   :  { %v982_v52 = vmax.f32 %v849_v9, 0.0 }
 0x163   :  { %v796_v2 = vadd.f32 %v795_v48, %v767_v62 }
 0x164   :  { %v992_v57 = vpack.c.bf16 %v982_v52, %v980_v51 }
 0x165   :  { %v822_v58 = vpop.f32.mrf.mxu2  ;;  %v851_v59 = vpop.f32.mrf.mxu3 }
 0x166   :  { %1146 = vmatmul.bf16.gmra.mxu0 %v992_v57  ;;  %v823_v1 = vadd.f32 %v822_v58, %v794_v60 }
 0x168   :  { %v865_v63 = vpop.f32.mrf.mxu0  ;;  %v894_v0 = vpop.f32.mrf.mxu1  ;;  %v852_v4 = vadd.f32 %v851_v59, %v823_v1 }
 0x169   :  { %v866_v16 = vadd.f32 %v865_v63, %v2381_v7 }
 0x16a   :  { %v984_v12 = vmax.f32 %v852_v4, 0.0 }
 0x16b   :  { %v895_v20 = vadd.f32 %v894_v0, %v866_v16 }
 0x16d   :  { %v824_v3 = vpop.f32.mrf.mxu2  ;;  %v853_v6 = vpop.f32.mrf.mxu3 }
 0x16e   :  { %v825_v5 = vadd.f32 %v824_v3, %v796_v2 }
 0x170   :  { %v854_v8 = vadd.f32 %v853_v6, %v825_v5  ;;  %v867_v10 = vpop.f32.mrf.mxu0  ;;  %v896_v11 = vpop.f32.mrf.mxu1 }
 0x171   :  { %v868_v22 = vadd.f32 %v867_v10, %v2381_v7 }
 0x172   :  { %v986_v15 = vmax.f32 %v854_v8, 0.0 }
 0x173   :  { %v897_v27 = vadd.f32 %v896_v11, %v868_v22 }
 0x174   :  { %v994_v17 = vpack.c.bf16 %v986_v15, %v984_v12 }
 0x175   :  { %v923_v50 = vpop.f32.mrf.mxu2  ;;  %v952_v18 = vpop.f32.mrf.mxu3 }
 0x176   :  { %1151 = vmatmul.bf16.gmra.mxu0 %v994_v17  ;;  %v924_v26 = vadd.f32 %v923_v50, %v895_v20  ;;  %v1960_v50 = vld [vmem:[#allocation7 + $0x38] sm:$0xff] }
 0x177   :  { %1266 = vmatpush.bf16.msrb.mxu2 %v1960_v50 }
 0x178   :  { %v870_v24 = vpop.f32.mrf.mxu0  ;;  %v899_v25 = vpop.f32.mrf.mxu1  ;;  %v953_v28 = vadd.f32 %v952_v18, %v924_v26 }
 0x179   :  { %v871_v36 = vadd.f32 %v870_v24, %v2381_v7 }
 0x17a   :  { %v973_v33 = vmax.f32 %v953_v28, 0.0  ;;  %v1959_v28 = vld [vmem:[#allocation7 + $0x30] sm:$0xff] }
 0x17b   :  { %v900_v21 = vadd.f32 %v899_v25, %v871_v36  ;;  %1267 = vmatpush.bf16.msrb.mxu2 %v1959_v28 }
 0x17d   :  { %v925_v49 = vpop.f32.mrf.mxu2  ;;  %v954_v30 = vpop.f32.mrf.mxu3 }
 0x17e   :  { %v926_v29 = vadd.f32 %v925_v49, %v897_v27 }
 0x180   :  { %v955_v31 = vadd.f32 %v954_v30, %v926_v29  ;;  %v872_v32 = vpop.f32.mrf.mxu0  ;;  %v901_v35 = vpop.f32.mrf.mxu1  ;;  %v1958_v29 = vld [vmem:[#allocation7 + $0x28] sm:$0xff]  ;;  %v1957_v30 = vld [vmem:[#allocation7 + $0x20] sm:$0xff] }
 0x181   :  { %v873_v40 = vadd.f32 %v872_v32, %v2381_v7  ;;  %1268 = vmatpush.bf16.msrb.mxu2 %v1958_v29  ;;  %v1954_v32 = vld [vmem:[#allocation7 + $0x8] sm:$0xff] }
 0x182   :  { %v975_v34 = vmax.f32 %v955_v31, 0.0  ;;  %v1955_v31 = vld [vmem:[#allocation7 + $0x10] sm:$0xff] }
 0x183   :  { %v902_v23 = vadd.f32 %v901_v35, %v873_v40 }
 0x184   :  { %v989_v37 = vpack.c.bf16 %v975_v34, %v973_v33  ;;  %v1953_v33 = vld [vmem:[#allocation7] sm:$0xff] }
 0x185   :  { %v928_v38 = vpop.f32.mrf.mxu2  ;;  %v957_v39 = vpop.f32.mrf.mxu3  ;;  %1269 = vmatpush.bf16.msrb.mxu2 %v1957_v30 }
 0x186   :  { %1165 = vmatmul.bf16.vlgmr.msrb.gmra.mxu1 %v989_v37  ;;  %v929_v42 = vadd.f32 %v928_v38, %v900_v21  ;;  %v1978_v37 = vld [vmem:[%s2412_s6] ss:$0 sm:$0xff] }
 0x188   :  { %v875_v41 = vpop.f32.mrf.mxu0  ;;  %v904_v43 = vpop.f32.mrf.mxu1  ;;  %v958_v45 = vadd.f32 %v957_v39, %v929_v42 }
 0x189   :  { %v876_v53 = vadd.f32 %v875_v41, %v2381_v7 }
 0x18a   :  { %v977_v19 = vmax.f32 %v958_v45, 0.0 }
 0x18b   :  { %v905_v52 = vadd.f32 %v904_v43, %v876_v53 }
 0x18d   :  { %v930_v44 = vpop.f32.mrf.mxu2  ;;  %v959_v55 = vpop.f32.mrf.mxu3 }
 0x18e   :  { %v931_v47 = vadd.f32 %v930_v44, %v902_v23 }
 0x190   :  { %v960_v61 = vadd.f32 %v959_v55, %v931_v47  ;;  %v877_v14 = vpop.f32.mrf.mxu0  ;;  %v906_v51 = vpop.f32.mrf.mxu1 }
 0x191   :  { %v878_v54 = vadd.f32 %v877_v14, %v2381_v7 }
 0x192   :  { %v979_v46 = vmax.f32 %v960_v61, 0.0 }
 0x193   :  { %v907_v58 = vadd.f32 %v906_v51, %v878_v54  ;;  %v1968_v51 = vld [vmem:[#allocation8 + $0x38] sm:$0xff] }
 0x194   :  { %v991_v9 = vpack.c.bf16 %v979_v46, %v977_v19  ;;  %1375 = vmatpush.bf16.msrb.mxu3 %v1968_v51 }
 0x195   :  { %v933_v13 = vpop.f32.mrf.mxu2  ;;  %v962_v48 = vpop.f32.mrf.mxu3 }
 0x196   :  { %1170 = vmatmul.bf16.gmra.mxu1 %v991_v9  ;;  %v934_v56 = vadd.f32 %v933_v13, %v905_v52 }
 0x198   :  { %v880_v57 = vpop.f32.mrf.mxu0  ;;  %v963_v60 = vadd.f32 %v962_v48, %v934_v56  ;;  %v909_v1 = vpop.f32.mrf.mxu1  ;;  %v1967_v56 = vld [vmem:[#allocation8 + $0x30] sm:$0xff] }
 0x199   :  { %v881_v4 = vadd.f32 %v880_v57, %v2381_v7  ;;  %1376 = vmatpush.bf16.msrb.mxu3 %v1967_v56 }
 0x19a   :  { %v981_v2 = vmax.f32 %v963_v60, 0.0 }
 0x19b   :  { %v910_v11 = vadd.f32 %v909_v1, %v881_v4 }
 0x19d   :  { %v935_v59 = vpop.f32.mrf.mxu2  ;;  %v964_v63 = vpop.f32.mrf.mxu3 }
 0x19e   :  { %v936_v62 = vadd.f32 %v935_v59, %v907_v58  ;;  %v1966_v58 = vld [vmem:[#allocation8 + $0x28] sm:$0xff] }
 0x19f   :  { %1377 = vmatpush.bf16.msrb.mxu3 %v1966_v58 }
 0x1a0   :  { %v965_v0 = vadd.f32 %v964_v63, %v936_v62  ;;  %v882_v6 = vpop.f32.mrf.mxu0  ;;  %v911_v16 = vpop.f32.mrf.mxu1 }
 0x1a1   :  { %v883_v12 = vadd.f32 %v882_v6, %v2381_v7  ;;  %v1956_v7 = vld [vmem:[#allocation7 + $0x18] sm:$0xff] }
 0x1a2   :  { %v983_v3 = vmax.f32 %v965_v0, 0.0  ;;  %1270 = vmatpush.bf16.msrb.mxu2 %v1956_v7  ;;  %v1965_v0 = vld [vmem:[#allocation8 + $0x20] sm:$0xff] }
 0x1a3   :  { %v912_v17 = vadd.f32 %v911_v16, %v883_v12  ;;  %1378 = vmatpush.bf16.msrb.mxu3 %v1965_v0  ;;  %v1962_v12 = vld [vmem:[#allocation8 + $0x8] sm:$0xff] }
 0x1a4   :  { %v993_v5 = vpack.c.bf16 %v983_v3, %v981_v2 }
 0x1a5   :  { %v938_v8 = vpop.f32.mrf.mxu2  ;;  %v967_v10 = vpop.f32.mrf.mxu3 }
 0x1a6   :  { %1175 = vmatmul.bf16.gmra.mxu1 %v993_v5  ;;  %v939_v15 = vadd.f32 %v938_v8, %v910_v11  ;;  %1271 = vmatpush.bf16.msrb.mxu2 %v1955_v31  ;;  %v1964_v5 = vld [vmem:[#allocation8 + $0x18] sm:$0xff]  ;;  %v1963_v8 = vld [vmem:[#allocation8 + $0x10] sm:$0xff] }
 0x1a7   :  { %1379 = vmatpush.bf16.msrb.mxu3 %v1964_v5 }
 0x1a8   :  { %v968_v20 = vadd.f32 %v967_v10, %v939_v15 }
 0x1aa   :  { %v985_v26 = vmax.f32 %v968_v20, 0.0  ;;  %1272 = vmatpush.bf16.msrb.mxu2 %v1954_v32 }
 0x1ab   :  { %1380 = vmatpush.bf16.msrb.mxu3 %v1963_v8 }
 0x1ad   :  { %v940_v18 = vpop.f32.mrf.mxu2  ;;  %v969_v24 = vpop.f32.mrf.mxu3 }
 0x1ae   :  { %v941_v22 = vadd.f32 %v940_v18, %v912_v17  ;;  %1273 = vmatpush.bf16.msrb.mxu2 %v1953_v33 }
 0x1af   :  { %1381 = vmatpush.bf16.msrb.mxu3 %v1962_v12 }
 0x1b0   :  { %v970_v25 = vadd.f32 %v969_v24, %v941_v22  ;;  %v1961_v24 = vld [vmem:[#allocation8] sm:$0xff] }
 0x1b2   :  { %v987_v27 = vmax.f32 %v970_v25, 0.0 }
 0x1b3   :  { %1382 = vmatpush.bf16.msrb.mxu3 %v1961_v24 }
 0x1b4   :  { %v995_v49 = vpack.c.bf16 %v987_v27, %v985_v26  ;;  %v1979_v26 = vld [vmem:[%s2414_s8] ss:$0 sm:$0xff] }
 0x1b6   :  { %1180 = vmatmul.bf16.gmra.mxu1 %v995_v49 }
 0x1c3   :  { %v1137_v34 = vpop.f32.mrf.mxu0 }
 0x1c4   :  { %v1138_v39 = vadd.f32 %v1978_v37, %v1137_v34 }
 0x1cb   :  { %v1139_v35 = vpop.f32.mrf.mxu0 }
 0x1cc   :  { %v1140_v21 = vadd.f32 %v1978_v37, %v1139_v35 }
 0x1d3   :  { %v1142_v38 = vpop.f32.mrf.mxu0 }
 0x1d4   :  { %v1143_v55 = vadd.f32 %v1978_v37, %v1142_v38 }
 0x1db   :  { %v1144_v44 = vpop.f32.mrf.mxu0 }
 0x1dc   :  { %v1145_v14 = vadd.f32 %v1978_v37, %v1144_v44 }
 0x1e3   :  { %v1147_v61 = vpop.f32.mrf.mxu0 }
 0x1e4   :  { %v1148_v57 = vadd.f32 %v1978_v37, %v1147_v61 }
 0x1eb   :  { %v1149_v52 = vpop.f32.mrf.mxu0 }
 0x1ec   :  { %v1150_v59 = vadd.f32 %v1978_v37, %v1149_v52 }
 0x1f3   :  { %v1152_v1 = vpop.f32.mrf.mxu0 }
 0x1f4   :  { %v1153_v11 = vadd.f32 %v1978_v37, %v1152_v1 }
 0x1fb   :  { %v1154_v10 = vpop.f32.mrf.mxu0 }
 0x1fc   :  { %v1155_v15 = vadd.f32 %v1978_v37, %v1154_v10 }
 0x203   :  { %v1166_v36 = vpop.f32.mrf.mxu1 }
 0x204   :  { %v1167_v40 = vadd.f32 %v1166_v36, %v1138_v39 }
 0x206   :  { %v1186_v23 = vmax.f32 %v1167_v40, 0.0 }
 0x20b   :  { %v1168_v41 = vpop.f32.mrf.mxu1 }
 0x20c   :  { %v1169_v42 = vadd.f32 %v1168_v41, %v1140_v21 }
 0x20e   :  { %v1187_v43 = vmax.f32 %v1169_v42, 0.0 }
 0x210   :  { %v1194_v45 = vpack.c.bf16 %v1187_v43, %v1186_v23 }
 0x212   :  { %1274 = vmatmul.bf16.vlgmr.msrb.gmra.mxu2 %v1194_v45 }
 0x213   :  { %v1171_v47 = vpop.f32.mrf.mxu1 }
 0x214   :  { %v1172_v19 = vadd.f32 %v1171_v47, %v1143_v55 }
 0x216   :  { %v1188_v9 = vmax.f32 %v1172_v19, 0.0  ;;  %v1980_v19 = vld [vmem:[%s2416_s10] ss:$0 sm:$0xff]  ;;  %s2117_s10 = smov [#allocation10]  }
 0x217   :  { %s1416_s28 = sshll.u32 %s2117_s10, 4  ;;  %s1417_s28 = int_to_ptr.vmem [resolvable:$true] %s1416_s28 }
 0x21b   :  { %v1173_v46 = vpop.f32.mrf.mxu1 }
 0x21c   :  { %v1174_v53 = vadd.f32 %v1173_v46, %v1145_v14 }
 0x21e   :  { %v1189_v13 = vmax.f32 %v1174_v53, 0.0 }
 0x220   :  { %v1195_v48 = vpack.c.bf16 %v1189_v13, %v1188_v9 }
 0x222   :  { %1279 = vmatmul.bf16.gmra.mxu2 %v1195_v48 }
 0x223   :  { %v1176_v54 = vpop.f32.mrf.mxu1 }
 0x224   :  { %v1177_v60 = vadd.f32 %v1176_v54, %v1148_v57 }
 0x226   :  { %v1190_v2 = vmax.f32 %v1177_v60, 0.0 }
 0x22b   :  { %v1178_v62 = vpop.f32.mrf.mxu1 }
 0x22c   :  { %v1179_v63 = vadd.f32 %v1178_v62, %v1150_v59 }
 0x22e   :  { %v1191_v3 = vmax.f32 %v1179_v63, 0.0 }
 0x230   :  { %v1196_v4 = vpack.c.bf16 %v1191_v3, %v1190_v2 }
 0x232   :  { %1284 = vmatmul.bf16.gmra.mxu2 %v1196_v4 }
 0x233   :  { %v1181_v6 = vpop.f32.mrf.mxu1 }
 0x234   :  { %v1182_v16 = vadd.f32 %v1181_v6, %v1153_v11 }
 0x236   :  { %v1192_v18 = vmax.f32 %v1182_v16, 0.0 }
 0x23b   :  { %v1183_v17 = vpop.f32.mrf.mxu1 }
 0x23c   :  { %v1184_v50 = vadd.f32 %v1183_v17, %v1155_v15 }
 0x23e   :  { %v1193_v20 = vmax.f32 %v1184_v50, 0.0 }
 0x240   :  { %v1197_v22 = vpack.c.bf16 %v1193_v20, %v1192_v18 }
 0x242   :  { %1289 = vmatmul.bf16.gmra.mxu2 %v1197_v22 }
 0x295   :  { %v1275_v25 = vpop.f32.mrf.mxu2 }
 0x296   :  { %v1276_v27 = vadd.f32 %v1979_v26, %v1275_v25 }
 0x298   :  { %v1295_v29 = vmax.f32 %v1276_v27, 0.0 }
 0x29d   :  { %v1277_v49 = vpop.f32.mrf.mxu2 }
 0x29e   :  { %v1278_v28 = vadd.f32 %v1979_v26, %v1277_v49 }
 0x2a0   :  { %v1296_v30 = vmax.f32 %v1278_v28, 0.0 }
 0x2a2   :  { %v1303_v7 = vpack.c.bf16 %v1296_v30, %v1295_v29 }
 0x2a4   :  { %1383 = vmatmul.bf16.vlgmr.msrb.gmra.mxu3 %v1303_v7 }
 0x2a5   :  { %v1280_v31 = vpop.f32.mrf.mxu2 }
 0x2a6   :  { %v1281_v32 = vadd.f32 %v1979_v26, %v1280_v31 }
 0x2a8   :  { %v1297_v35 = vmax.f32 %v1281_v32, 0.0 }
 0x2ad   :  { %v1282_v33 = vpop.f32.mrf.mxu2 }
 0x2ae   :  { %v1283_v34 = vadd.f32 %v1979_v26, %v1282_v33 }
 0x2b0   :  { %v1298_v36 = vmax.f32 %v1283_v34, 0.0 }
 0x2b2   :  { %v1304_v37 = vpack.c.bf16 %v1298_v36, %v1297_v35 }
 0x2b4   :  { %1388 = vmatmul.bf16.gmra.mxu3 %v1304_v37 }
 0x2b5   :  { %v1285_v38 = vpop.f32.mrf.mxu2 }
 0x2b6   :  { %v1286_v39 = vadd.f32 %v1979_v26, %v1285_v38 }
 0x2b8   :  { %v1299_v41 = vmax.f32 %v1286_v39, 0.0 }
 0x2bd   :  { %v1287_v21 = vpop.f32.mrf.mxu2 }
 0x2be   :  { %v1288_v40 = vadd.f32 %v1979_v26, %v1287_v21 }
 0x2c0   :  { %v1300_v42 = vmax.f32 %v1288_v40, 0.0 }
 0x2c2   :  { %v1305_v23 = vpack.c.bf16 %v1300_v42, %v1299_v41 }
 0x2c4   :  { %1393 = vmatmul.bf16.gmra.mxu3 %v1305_v23 }
 0x2c5   :  { %v1290_v43 = vpop.f32.mrf.mxu2 }
 0x2c6   :  { %v1291_v44 = vadd.f32 %v1979_v26, %v1290_v43 }
 0x2c8   :  { %v1301_v55 = vmax.f32 %v1291_v44, 0.0 }
 0x2cd   :  { %v1292_v45 = vpop.f32.mrf.mxu2 }
 0x2ce   :  { %v1293_v47 = vadd.f32 %v1979_v26, %v1292_v45 }
 0x2d0   :  { %v1302_v61 = vmax.f32 %v1293_v47, 0.0 }
 0x2d2   :  { %v1306_v14 = vpack.c.bf16 %v1302_v61, %v1301_v55 }
 0x2d4   :  { %1398 = vmatmul.bf16.gmra.mxu3 %v1306_v14 }
 0x327   :  { %v1384_v46 = vpop.f32.mrf.mxu3 }
 0x328   :  { %v1385_v53 = vadd.f32 %v1980_v19, %v1384_v46 }
 0x32a   :  { %1404 = vst [vmem:[#allocation10] sm:$0xff] %v1385_v53 }
 0x32f   :  { %v1386_v9 = vpop.f32.mrf.mxu3 }
 0x330   :  { %v1387_v13 = vadd.f32 %v1980_v19, %v1386_v9 }
 0x332   :  { %1405 = vst [vmem:[#allocation10 + $0x8] sm:$0xff] %v1387_v13 }
 0x337   :  { %v1389_v48 = vpop.f32.mrf.mxu3 }
 0x338   :  { %v1390_v51 = vadd.f32 %v1980_v19, %v1389_v48 }
 0x33a   :  { %1406 = vst [vmem:[#allocation10 + $0x10] sm:$0xff] %v1390_v51 }
 0x33f   :  { %v1391_v52 = vpop.f32.mrf.mxu3 }
 0x340   :  { %v1392_v54 = vadd.f32 %v1980_v19, %v1391_v52 }
 0x342   :  { %1407 = vst [vmem:[#allocation10 + $0x18] sm:$0xff] %v1392_v54 }
 0x347   :  { %v1394_v56 = vpop.f32.mrf.mxu3 }
 0x348   :  { %v1395_v57 = vadd.f32 %v1980_v19, %v1394_v56 }
 0x34a   :  { %1408 = vst [vmem:[#allocation10 + $0x20] sm:$0xff] %v1395_v57 }
 0x34f   :  { %v1396_v58 = vpop.f32.mrf.mxu3 }
 0x350   :  { %v1397_v59 = vadd.f32 %v1980_v19, %v1396_v58 }
 0x352   :  { %1409 = vst [vmem:[#allocation10 + $0x28] sm:$0xff] %v1397_v59 }
 0x357   :  { %v1399_v60 = vpop.f32.mrf.mxu3 }
 0x358   :  { %v1400_v62 = vadd.f32 %v1980_v19, %v1399_v60 }
 0x35a   :  { %1410 = vst [vmem:[#allocation10 + $0x30] sm:$0xff] %v1400_v62 }
 0x35f   :  { %v1401_v63 = vpop.f32.mrf.mxu3 }
 0x360   :  { %v1402_v0 = vadd.f32 %v1980_v19, %v1401_v63 }
 0x362   :  { %1411 = vst [vmem:[#allocation10 + $0x38] sm:$0xff] %v1402_v0 }
 0x363   :  { %1424 = dma.vmem_to_hbm [thread:$0]  %s1417_s28, 1024, %s1419_s13, [#allocation4], %s2113_s29, %s2113_s29, %s2114_s30  }
 0x364   :  { %2107 = dma.done.wait [#allocation4], 1024  }
 0x365   :  { %2108 = vsyncadd [#allocation4], 4294966272 }
 0x366   :  { %1429 = vsyncpa [#allocation3], 1 }
 0x367   :  { %1430 = vsyncpa [#allocation6], 1 }
 0x368   :  { %1431 = vsyncpa [#allocation9], 1 }
 0x369   :  { %1432 = vsyncpa [#allocation4], 1 }

</bundles_post_ra>
